<compile_context>
chip_gen: v6e
topology: v6e:2x2x1
jax: 0.10.0
libtpu: 0.0.40
codegen_flags: <defaults>
</compile_context>

<pallas_src>
import numpy as np
import jax
import jax.numpy as jnp
from jax import lax
from jax.experimental import pallas as pl
from jax.experimental.pallas import tpu as pltpu


# ------------------------------ Pallas kernel ------------------------------ #
def _fused_cnn_kernel(xs_ref, sel1_ref, w1_ref, b1_ref,
                      sel2_ref, w2_ref, b2_ref, o_ref):
    """One batch element per grid step; everything resident in VMEM.

    xs_ref  : (1, P1*P1, S1*S1*C)       space-to-depth input      (1, 81, 64)
    sel1_ref: (T1, OH1*OH1, P1*P1)      0/1 row selectors, conv1  (4, 64, 81)
    w1_ref  : (T1*S1*S1*C, OC1)         conv1 weight, tap-major   (256, 32)
    b1_ref  : (1, OC1)
    sel2_ref: (K2*K2, OH2*OH2, OH1*OH1) 0/1 row selectors, conv2  (16, 9, 64)
    w2_ref  : (K2*K2*OC1, OC2)          conv2 weight, tap-major   (512, 64)
    b2_ref  : (1, OC2)
    o_ref   : (1, OH2*OH2, OC2)                                   (1, 9, 64)
    """
    xs = xs_ref[0]                                        # (81, 64)

    # conv1: build the im2col patch matrix in VMEM via MXU row selections,
    # then one K=256 matmul + bias + ReLU.
    p1 = jnp.concatenate(
        [jnp.dot(sel1_ref[t], xs, preferred_element_type=jnp.float32)
         for t in range(sel1_ref.shape[0])], axis=-1)     # (64, 256)
    h1 = jnp.dot(p1, w1_ref[...], preferred_element_type=jnp.float32)
    h1 = jnp.maximum(h1 + b1_ref[...], 0.0)               # (64, 32) = (8*8, 32)

    # conv2: same trick directly on the VMEM-resident activation.
    p2 = jnp.concatenate(
        [jnp.dot(sel2_ref[t], h1, preferred_element_type=jnp.float32)
         for t in range(sel2_ref.shape[0])], axis=-1)     # (9, 512)
    h2 = jnp.dot(p2, w2_ref[...], preferred_element_type=jnp.float32)
    h2 = jnp.maximum(h2 + b2_ref[...], 0.0)               # (9, 64)

    o_ref[0] = h2.astype(o_ref.dtype)


# ------------------------------ host helpers ------------------------------- #
def _space_to_depth(x, s):
    """(B, C, H, W) -> (B, (H//s)*(W//s), s*s*C), feature order (di, dj, c)."""
    b, c, h, w = x.shape
    p, q = h // s, w // s
    x = x.reshape(b, c, p, s, q, s)
    x = x.transpose(0, 2, 4, 3, 5, 1)                     # [b, p, q, di, dj, c]
    return x.reshape(b, p * q, s * s * c)


def _prep_w1(w1, s1):
    """(OC1, C, K1, K1) -> (T1*s1*s1*C, OC1), rows ordered (tap=(ti,tj), di, dj, c)."""
    oc1, c, k1, _ = w1.shape
    t = k1 // s1
    w = w1.transpose(2, 3, 1, 0)                          # [kh, kw, c, oc]
    w = w.reshape(t, s1, t, s1, c, oc1)                   # [ti, di, tj, dj, c, oc]
    w = w.transpose(0, 2, 1, 3, 4, 5)                     # [ti, tj, di, dj, c, oc]
    return w.reshape(t * t * s1 * s1 * c, oc1)


def _prep_w2(w2):
    """(OC2, OC1, K2, K2) -> (K2*K2*OC1, OC2), rows ordered (kh, kw, c1)."""
    oc2, oc1, k2, _ = w2.shape
    return w2.transpose(2, 3, 1, 0).reshape(k2 * k2 * oc1, oc2)


def _make_sel1(oh1, p1, taps):
    """Conv1 row selectors over the space-to-depth grid: (taps^2, oh1^2, p1^2)."""
    sel = np.zeros((taps * taps, oh1 * oh1, p1 * p1), np.float32)
    for ti in range(taps):
        for tj in range(taps):
            t = ti * taps + tj
            for oh in range(oh1):
                for ow in range(oh1):
                    sel[t, oh * oh1 + ow, (oh + ti) * p1 + (ow + tj)] = 1.0
    return jnp.asarray(sel)


def _make_sel2(oh2, oh1, k2, s2):
    """Conv2 row selectors over the conv1 activation grid: (k2^2, oh2^2, oh1^2)."""
    sel = np.zeros((k2 * k2, oh2 * oh2, oh1 * oh1), np.float32)
    for kh in range(k2):
        for kw in range(k2):
            t = kh * k2 + kw
            for oh in range(oh2):
                for ow in range(oh2):
                    sel[t, oh * oh2 + ow, (s2 * oh + kh) * oh1 + (s2 * ow + kw)] = 1.0
    return jnp.asarray(sel)


# -------------------------------- forward ---------------------------------- #
def cnn_forward(x, params):
    """Forward of CNN(dims=[32,64], kernel=[8,4], stride=[4,2]).build(in_dim=C)."""
    (w1, b1), (w2, b2) = params
    B, C, H, W = x.shape
    OC1, IC1, K1, _ = w1.shape
    OC2, IC2, K2, _ = w2.shape
    S1, S2 = 4, 2
    # TODO(synk): arbitrary kernel/stride configs (kernel != 2*stride, H % stride != 0)
    # would need a generic tap loop; the default CNN config satisfies these asserts.
    assert IC1 == C and IC2 == OC1 and K1 == 2 * S1 and K2 == 2 * S2
    assert H == W and H % S1 == 0

    P1 = H // S1                        # 9   space-to-depth grid side
    OH1 = P1 - 1                        # 8   conv1 output side (= (H-K1)//S1 + 1)
    OH2 = (OH1 - K2) // S2 + 1          # 3   conv2 output side
    T1 = (K1 // S1) ** 2                # 4
    T2 = K2 * K2                        # 16
    F1 = S1 * S1 * C                    # 64
    M1, M2 = OH1 * OH1, OH2 * OH2       # 64, 9

    xs = _space_to_depth(x, S1)         # (B, 81, 64)
    w1m = _prep_w1(w1, S1)              # (256, 32)
    w2m = _prep_w2(w2)                  # (512, 64)
    b1m = b1.reshape(1, OC1)
    b2m = b2.reshape(1, OC2)
    sel1 = _make_sel1(OH1, P1, K1 // S1)   # (4, 64, 81)  constant
    sel2 = _make_sel2(OH2, OH1, K2, S2)    # (16, 9, 64)  constant

    flops = B * (2 * T1 * M1 * (P1 * P1) * F1 + 2 * M1 * (T1 * F1) * OC1
                 + 2 * T2 * M2 * M1 * OC1 + 2 * M2 * (T2 * OC1) * OC2)
    bytes_acc = 4 * (xs.size + sel1.size + w1m.size + b1m.size
                     + sel2.size + w2m.size + b2m.size + B * M2 * OC2)

    out = pl.pallas_call(
        _fused_cnn_kernel,
        out_shape=jax.ShapeDtypeStruct((B, M2, OC2), jnp.float32),
        grid=(B,),
        in_specs=[
            pl.BlockSpec((1, P1 * P1, F1), lambda b: (b, 0, 0)),
            pl.BlockSpec((T1, M1, P1 * P1), lambda b: (0, 0, 0)),
            pl.BlockSpec((T1 * F1, OC1), lambda b: (0, 0)),
            pl.BlockSpec((1, OC1), lambda b: (0, 0)),
            pl.BlockSpec((T2, M2, M1), lambda b: (0, 0, 0)),
            pl.BlockSpec((T2 * OC1, OC2), lambda b: (0, 0)),
            pl.BlockSpec((1, OC2), lambda b: (0, 0)),
        ],
        out_specs=pl.BlockSpec((1, M2, OC2), lambda b: (b, 0, 0)),
        compiler_params=pltpu.CompilerParams(
            dimension_semantics=("parallel",)),
        cost_estimate=pl.CostEstimate(
            flops=int(flops), transcendentals=0, bytes_accessed=int(bytes_acc)),
    )(xs, sel1, w1m, b1m, sel2, w2m, b2m)                 # (B, 9, 64), rows=(oh,ow)

    # Single tiny reorder so flattening matches nn.Flatten(start_dim=-3) on NCHW.
    return out.reshape(B, OH2, OH2, OC2).transpose(0, 3, 1, 2).reshape(B, -1)


# --------------------------- reference (sanity) ----------------------------- #
def _conv_relu_ref(x, w, b, stride):
    y = lax.conv_general_dilated(
        x, w, window_strides=(stride, stride), padding="VALID",
        dimension_numbers=("NCHW", "OIHW", "NCHW"))
    return jnp.maximum(y + b.reshape(1, -1, 1, 1), 0.0)


def cnn_forward_ref(x, params):
    (w1, b1), (w2, b2) = params
    h1 = _conv_relu_ref(x, w1, b1, 4)
    h2 = _conv_relu_ref(h1, w2, b2, 2)
    return h2.reshape(h2.shape[0], -1)


# ---------------------------------- main ------------------------------------ #
if __name__ == "__main__":
    key = jax.random.PRNGKey(0)
    B, C, H, W = 2, 4, 36, 36          # conv1 -> 8x8, conv2 -> 3x3, flatten -> 64*9
    dims, kernels, strides = [32, 64], [8, 4], [4, 2]

    kx, kw1, kb1, kw2, kb2 = jax.random.split(key, 5)
    x = jax.random.normal(kx, (B, C, H, W), dtype=jnp.float32)
    w1 = 0.05 * jax.random.normal(kw1, (dims[0], C, kernels[0], kernels[0]), dtype=jnp.float32)
    b1 = 0.01 * jax.random.normal(kb1, (dims[0],), dtype=jnp.float32)
    w2 = 0.05 * jax.random.normal(kw2, (dims[1], dims[0], kernels[1], kernels[1]), dtype=jnp.float32)
    b2 = 0.01 * jax.random.normal(kb2, (dims[1],), dtype=jnp.float32)
    params = ((w1, b1), (w2, b2))

    fwd = jax.jit(cnn_forward)
    out = jax.block_until_ready(fwd(x, params))
    ref = jax.block_until_ready(cnn_forward_ref(x, params))

    assert out.shape == (B, dims[1] * 3 * 3), out.shape
    assert jnp.allclose(out, ref, atol=1e-4, rtol=1e-4), float(jnp.max(jnp.abs(out - ref)))
    print("KERNEL_OK")
</pallas_src>

<mosaic_0001>
module attributes {stable_mosaic.version = 11 : i64} {
  func.func @_fused_cnn_kernel(%arg0: i32, %arg1: memref<1x81x64xf32, #tpu.memory_space<vmem>>, %arg2: memref<4x64x81xf32, #tpu.memory_space<vmem>>, %arg3: memref<256x32xf32, #tpu.memory_space<vmem>>, %arg4: memref<1x32xf32, #tpu.memory_space<vmem>>, %arg5: memref<16x9x64xf32, #tpu.memory_space<vmem>>, %arg6: memref<512x64xf32, #tpu.memory_space<vmem>>, %arg7: memref<1x64xf32, #tpu.memory_space<vmem>>, %arg8: memref<1x9x64xf32, #tpu.memory_space<vmem>>) attributes {dimension_semantics = [#tpu.dimension_semantics<parallel>], iteration_bounds = array<i64: 2>, scalar_prefetch = 0 : i64, scratch_operands = 0 : i64, tpu.core_type = #tpu.core_type<tc>, window_params = [{transform_indices = @transform_0, window_bounds = array<i64: 1, 81, 64>}, {pipeline_mode = #tpu.pipeline_mode<synchronous>, transform_indices = @transform_1, window_bounds = array<i64: 4, 64, 81>}, {pipeline_mode = #tpu.pipeline_mode<synchronous>, transform_indices = @transform_2, window_bounds = array<i64: 256, 32>}, {pipeline_mode = #tpu.pipeline_mode<synchronous>, transform_indices = @transform_3, window_bounds = array<i64: 1, 32>}, {pipeline_mode = #tpu.pipeline_mode<synchronous>, transform_indices = @transform_4, window_bounds = array<i64: 16, 9, 64>}, {pipeline_mode = #tpu.pipeline_mode<synchronous>, transform_indices = @transform_5, window_bounds = array<i64: 512, 64>}, {pipeline_mode = #tpu.pipeline_mode<synchronous>, transform_indices = @transform_6, window_bounds = array<i64: 1, 64>}, {transform_indices = @transform_7, window_bounds = array<i64: 1, 9, 64>}]} {
    %c0 = arith.constant 0 : index
    %c0_0 = arith.constant 0 : index
    %c0_1 = arith.constant 0 : index
    %0 = vector.load %arg1[%c0, %c0_0, %c0_1] : memref<1x81x64xf32, #tpu.memory_space<vmem>>, vector<1x81x64xf32>
    %1 = vector.shape_cast %0 : vector<1x81x64xf32> to vector<81x64xf32>
    %c0_2 = arith.constant 0 : index
    %c0_3 = arith.constant 0 : index
    %c0_4 = arith.constant 0 : index
    %2 = vector.load %arg2[%c0_2, %c0_3, %c0_4] : memref<4x64x81xf32, #tpu.memory_space<vmem>>, vector<1x64x81xf32>
    %3 = vector.shape_cast %2 : vector<1x64x81xf32> to vector<64x81xf32>
    %cst = arith.constant dense<0.000000e+00> : vector<64x64xf32>
    %4 = tpu.matmul %3, %1, %cst {dimension_numbers = #tpu.dot_dimension_numbers<[1], [0], [0], [1], [0, 0, 1, 1], [], []>} : vector<64x81xf32>, vector<81x64xf32>, vector<64x64xf32> -> vector<64x64xf32>
    %c1 = arith.constant 1 : index
    %c0_5 = arith.constant 0 : index
    %c0_6 = arith.constant 0 : index
    %5 = vector.load %arg2[%c1, %c0_5, %c0_6] : memref<4x64x81xf32, #tpu.memory_space<vmem>>, vector<1x64x81xf32>
    %6 = vector.shape_cast %5 : vector<1x64x81xf32> to vector<64x81xf32>
    %cst_7 = arith.constant dense<0.000000e+00> : vector<64x64xf32>
    %7 = tpu.matmul %6, %1, %cst_7 {dimension_numbers = #tpu.dot_dimension_numbers<[1], [0], [0], [1], [0, 0, 1, 1], [], []>} : vector<64x81xf32>, vector<81x64xf32>, vector<64x64xf32> -> vector<64x64xf32>
    %c2 = arith.constant 2 : index
    %c0_8 = arith.constant 0 : index
    %c0_9 = arith.constant 0 : index
    %8 = vector.load %arg2[%c2, %c0_8, %c0_9] : memref<4x64x81xf32, #tpu.memory_space<vmem>>, vector<1x64x81xf32>
    %9 = vector.shape_cast %8 : vector<1x64x81xf32> to vector<64x81xf32>
    %cst_10 = arith.constant dense<0.000000e+00> : vector<64x64xf32>
    %10 = tpu.matmul %9, %1, %cst_10 {dimension_numbers = #tpu.dot_dimension_numbers<[1], [0], [0], [1], [0, 0, 1, 1], [], []>} : vector<64x81xf32>, vector<81x64xf32>, vector<64x64xf32> -> vector<64x64xf32>
    %c3 = arith.constant 3 : index
    %c0_11 = arith.constant 0 : index
    %c0_12 = arith.constant 0 : index
    %11 = vector.load %arg2[%c3, %c0_11, %c0_12] : memref<4x64x81xf32, #tpu.memory_space<vmem>>, vector<1x64x81xf32>
    %12 = vector.shape_cast %11 : vector<1x64x81xf32> to vector<64x81xf32>
    %cst_13 = arith.constant dense<0.000000e+00> : vector<64x64xf32>
    %13 = tpu.matmul %12, %1, %cst_13 {dimension_numbers = #tpu.dot_dimension_numbers<[1], [0], [0], [1], [0, 0, 1, 1], [], []>} : vector<64x81xf32>, vector<81x64xf32>, vector<64x64xf32> -> vector<64x64xf32>
    %14 = tpu.concatenate %4, %7, %10, %13 in 1 : vector<64x64xf32>, vector<64x64xf32>, vector<64x64xf32>, vector<64x64xf32> -> vector<64x256xf32>
    %c0_14 = arith.constant 0 : index
    %c0_15 = arith.constant 0 : index
    %15 = vector.load %arg3[%c0_14, %c0_15] : memref<256x32xf32, #tpu.memory_space<vmem>>, vector<256x32xf32>
    %cst_16 = arith.constant dense<0.000000e+00> : vector<64x32xf32>
    %16 = tpu.matmul %14, %15, %cst_16 {dimension_numbers = #tpu.dot_dimension_numbers<[1], [0], [0], [1], [0, 0, 1, 1], [], []>} : vector<64x256xf32>, vector<256x32xf32>, vector<64x32xf32> -> vector<64x32xf32>
    %c0_17 = arith.constant 0 : index
    %c0_18 = arith.constant 0 : index
    %17 = vector.load %arg4[%c0_17, %c0_18] : memref<1x32xf32, #tpu.memory_space<vmem>>, vector<1x32xf32>
    %18 = vector.broadcast %17 : vector<1x32xf32> to vector<64x32xf32>
    %19 = arith.addf %16, %18 : vector<64x32xf32>
    %cst_19 = arith.constant 0.000000e+00 : f32
    %20 = vector.broadcast %cst_19 : f32 to vector<64x32xf32>
    %21 = arith.maximumf %19, %20 : vector<64x32xf32>
    %c0_20 = arith.constant 0 : index
    %c0_21 = arith.constant 0 : index
    %c0_22 = arith.constant 0 : index
    %22 = vector.load %arg5[%c0_20, %c0_21, %c0_22] : memref<16x9x64xf32, #tpu.memory_space<vmem>>, vector<1x9x64xf32>
    %23 = vector.shape_cast %22 : vector<1x9x64xf32> to vector<9x64xf32>
    %cst_23 = arith.constant dense<0.000000e+00> : vector<9x32xf32>
    %24 = tpu.matmul %23, %21, %cst_23 {dimension_numbers = #tpu.dot_dimension_numbers<[1], [0], [0], [1], [0, 0, 1, 1], [], []>} : vector<9x64xf32>, vector<64x32xf32>, vector<9x32xf32> -> vector<9x32xf32>
    %c1_24 = arith.constant 1 : index
    %c0_25 = arith.constant 0 : index
    %c0_26 = arith.constant 0 : index
    %25 = vector.load %arg5[%c1_24, %c0_25, %c0_26] : memref<16x9x64xf32, #tpu.memory_space<vmem>>, vector<1x9x64xf32>
    %26 = vector.shape_cast %25 : vector<1x9x64xf32> to vector<9x64xf32>
    %cst_27 = arith.constant dense<0.000000e+00> : vector<9x32xf32>
    %27 = tpu.matmul %26, %21, %cst_27 {dimension_numbers = #tpu.dot_dimension_numbers<[1], [0], [0], [1], [0, 0, 1, 1], [], []>} : vector<9x64xf32>, vector<64x32xf32>, vector<9x32xf32> -> vector<9x32xf32>
    %c2_28 = arith.constant 2 : index
    %c0_29 = arith.constant 0 : index
    %c0_30 = arith.constant 0 : index
    %28 = vector.load %arg5[%c2_28, %c0_29, %c0_30] : memref<16x9x64xf32, #tpu.memory_space<vmem>>, vector<1x9x64xf32>
    %29 = vector.shape_cast %28 : vector<1x9x64xf32> to vector<9x64xf32>
    %cst_31 = arith.constant dense<0.000000e+00> : vector<9x32xf32>
    %30 = tpu.matmul %29, %21, %cst_31 {dimension_numbers = #tpu.dot_dimension_numbers<[1], [0], [0], [1], [0, 0, 1, 1], [], []>} : vector<9x64xf32>, vector<64x32xf32>, vector<9x32xf32> -> vector<9x32xf32>
    %c3_32 = arith.constant 3 : index
    %c0_33 = arith.constant 0 : index
    %c0_34 = arith.constant 0 : index
    %31 = vector.load %arg5[%c3_32, %c0_33, %c0_34] : memref<16x9x64xf32, #tpu.memory_space<vmem>>, vector<1x9x64xf32>
    %32 = vector.shape_cast %31 : vector<1x9x64xf32> to vector<9x64xf32>
    %cst_35 = arith.constant dense<0.000000e+00> : vector<9x32xf32>
    %33 = tpu.matmul %32, %21, %cst_35 {dimension_numbers = #tpu.dot_dimension_numbers<[1], [0], [0], [1], [0, 0, 1, 1], [], []>} : vector<9x64xf32>, vector<64x32xf32>, vector<9x32xf32> -> vector<9x32xf32>
    %c4 = arith.constant 4 : index
    %c0_36 = arith.constant 0 : index
    %c0_37 = arith.constant 0 : index
    %34 = vector.load %arg5[%c4, %c0_36, %c0_37] : memref<16x9x64xf32, #tpu.memory_space<vmem>>, vector<1x9x64xf32>
    %35 = vector.shape_cast %34 : vector<1x9x64xf32> to vector<9x64xf32>
    %cst_38 = arith.constant dense<0.000000e+00> : vector<9x32xf32>
    %36 = tpu.matmul %35, %21, %cst_38 {dimension_numbers = #tpu.dot_dimension_numbers<[1], [0], [0], [1], [0, 0, 1, 1], [], []>} : vector<9x64xf32>, vector<64x32xf32>, vector<9x32xf32> -> vector<9x32xf32>
    %c5 = arith.constant 5 : index
    %c0_39 = arith.constant 0 : index
    %c0_40 = arith.constant 0 : index
    %37 = vector.load %arg5[%c5, %c0_39, %c0_40] : memref<16x9x64xf32, #tpu.memory_space<vmem>>, vector<1x9x64xf32>
    %38 = vector.shape_cast %37 : vector<1x9x64xf32> to vector<9x64xf32>
    %cst_41 = arith.constant dense<0.000000e+00> : vector<9x32xf32>
    %39 = tpu.matmul %38, %21, %cst_41 {dimension_numbers = #tpu.dot_dimension_numbers<[1], [0], [0], [1], [0, 0, 1, 1], [], []>} : vector<9x64xf32>, vector<64x32xf32>, vector<9x32xf32> -> vector<9x32xf32>
    %c6 = arith.constant 6 : index
    %c0_42 = arith.constant 0 : index
    %c0_43 = arith.constant 0 : index
    %40 = vector.load %arg5[%c6, %c0_42, %c0_43] : memref<16x9x64xf32, #tpu.memory_space<vmem>>, vector<1x9x64xf32>
    %41 = vector.shape_cast %40 : vector<1x9x64xf32> to vector<9x64xf32>
    %cst_44 = arith.constant dense<0.000000e+00> : vector<9x32xf32>
    %42 = tpu.matmul %41, %21, %cst_44 {dimension_numbers = #tpu.dot_dimension_numbers<[1], [0], [0], [1], [0, 0, 1, 1], [], []>} : vector<9x64xf32>, vector<64x32xf32>, vector<9x32xf32> -> vector<9x32xf32>
    %c7 = arith.constant 7 : index
    %c0_45 = arith.constant 0 : index
    %c0_46 = arith.constant 0 : index
    %43 = vector.load %arg5[%c7, %c0_45, %c0_46] : memref<16x9x64xf32, #tpu.memory_space<vmem>>, vector<1x9x64xf32>
    %44 = vector.shape_cast %43 : vector<1x9x64xf32> to vector<9x64xf32>
    %cst_47 = arith.constant dense<0.000000e+00> : vector<9x32xf32>
    %45 = tpu.matmul %44, %21, %cst_47 {dimension_numbers = #tpu.dot_dimension_numbers<[1], [0], [0], [1], [0, 0, 1, 1], [], []>} : vector<9x64xf32>, vector<64x32xf32>, vector<9x32xf32> -> vector<9x32xf32>
    %c8 = arith.constant 8 : index
    %c0_48 = arith.constant 0 : index
    %c0_49 = arith.constant 0 : index
    %46 = vector.load %arg5[%c8, %c0_48, %c0_49] : memref<16x9x64xf32, #tpu.memory_space<vmem>>, vector<1x9x64xf32>
    %47 = vector.shape_cast %46 : vector<1x9x64xf32> to vector<9x64xf32>
    %cst_50 = arith.constant dense<0.000000e+00> : vector<9x32xf32>
    %48 = tpu.matmul %47, %21, %cst_50 {dimension_numbers = #tpu.dot_dimension_numbers<[1], [0], [0], [1], [0, 0, 1, 1], [], []>} : vector<9x64xf32>, vector<64x32xf32>, vector<9x32xf32> -> vector<9x32xf32>
    %c9 = arith.constant 9 : index
    %c0_51 = arith.constant 0 : index
    %c0_52 = arith.constant 0 : index
    %49 = vector.load %arg5[%c9, %c0_51, %c0_52] : memref<16x9x64xf32, #tpu.memory_space<vmem>>, vector<1x9x64xf32>
    %50 = vector.shape_cast %49 : vector<1x9x64xf32> to vector<9x64xf32>
    %cst_53 = arith.constant dense<0.000000e+00> : vector<9x32xf32>
    %51 = tpu.matmul %50, %21, %cst_53 {dimension_numbers = #tpu.dot_dimension_numbers<[1], [0], [0], [1], [0, 0, 1, 1], [], []>} : vector<9x64xf32>, vector<64x32xf32>, vector<9x32xf32> -> vector<9x32xf32>
    %c10 = arith.constant 10 : index
    %c0_54 = arith.constant 0 : index
    %c0_55 = arith.constant 0 : index
    %52 = vector.load %arg5[%c10, %c0_54, %c0_55] : memref<16x9x64xf32, #tpu.memory_space<vmem>>, vector<1x9x64xf32>
    %53 = vector.shape_cast %52 : vector<1x9x64xf32> to vector<9x64xf32>
    %cst_56 = arith.constant dense<0.000000e+00> : vector<9x32xf32>
    %54 = tpu.matmul %53, %21, %cst_56 {dimension_numbers = #tpu.dot_dimension_numbers<[1], [0], [0], [1], [0, 0, 1, 1], [], []>} : vector<9x64xf32>, vector<64x32xf32>, vector<9x32xf32> -> vector<9x32xf32>
    %c11 = arith.constant 11 : index
    %c0_57 = arith.constant 0 : index
    %c0_58 = arith.constant 0 : index
    %55 = vector.load %arg5[%c11, %c0_57, %c0_58] : memref<16x9x64xf32, #tpu.memory_space<vmem>>, vector<1x9x64xf32>
    %56 = vector.shape_cast %55 : vector<1x9x64xf32> to vector<9x64xf32>
    %cst_59 = arith.constant dense<0.000000e+00> : vector<9x32xf32>
    %57 = tpu.matmul %56, %21, %cst_59 {dimension_numbers = #tpu.dot_dimension_numbers<[1], [0], [0], [1], [0, 0, 1, 1], [], []>} : vector<9x64xf32>, vector<64x32xf32>, vector<9x32xf32> -> vector<9x32xf32>
    %c12 = arith.constant 12 : index
    %c0_60 = arith.constant 0 : index
    %c0_61 = arith.constant 0 : index
    %58 = vector.load %arg5[%c12, %c0_60, %c0_61] : memref<16x9x64xf32, #tpu.memory_space<vmem>>, vector<1x9x64xf32>
    %59 = vector.shape_cast %58 : vector<1x9x64xf32> to vector<9x64xf32>
    %cst_62 = arith.constant dense<0.000000e+00> : vector<9x32xf32>
    %60 = tpu.matmul %59, %21, %cst_62 {dimension_numbers = #tpu.dot_dimension_numbers<[1], [0], [0], [1], [0, 0, 1, 1], [], []>} : vector<9x64xf32>, vector<64x32xf32>, vector<9x32xf32> -> vector<9x32xf32>
    %c13 = arith.constant 13 : index
    %c0_63 = arith.constant 0 : index
    %c0_64 = arith.constant 0 : index
    %61 = vector.load %arg5[%c13, %c0_63, %c0_64] : memref<16x9x64xf32, #tpu.memory_space<vmem>>, vector<1x9x64xf32>
    %62 = vector.shape_cast %61 : vector<1x9x64xf32> to vector<9x64xf32>
    %cst_65 = arith.constant dense<0.000000e+00> : vector<9x32xf32>
    %63 = tpu.matmul %62, %21, %cst_65 {dimension_numbers = #tpu.dot_dimension_numbers<[1], [0], [0], [1], [0, 0, 1, 1], [], []>} : vector<9x64xf32>, vector<64x32xf32>, vector<9x32xf32> -> vector<9x32xf32>
    %c14 = arith.constant 14 : index
    %c0_66 = arith.constant 0 : index
    %c0_67 = arith.constant 0 : index
    %64 = vector.load %arg5[%c14, %c0_66, %c0_67] : memref<16x9x64xf32, #tpu.memory_space<vmem>>, vector<1x9x64xf32>
    %65 = vector.shape_cast %64 : vector<1x9x64xf32> to vector<9x64xf32>
    %cst_68 = arith.constant dense<0.000000e+00> : vector<9x32xf32>
    %66 = tpu.matmul %65, %21, %cst_68 {dimension_numbers = #tpu.dot_dimension_numbers<[1], [0], [0], [1], [0, 0, 1, 1], [], []>} : vector<9x64xf32>, vector<64x32xf32>, vector<9x32xf32> -> vector<9x32xf32>
    %c15 = arith.constant 15 : index
    %c0_69 = arith.constant 0 : index
    %c0_70 = arith.constant 0 : index
    %67 = vector.load %arg5[%c15, %c0_69, %c0_70] : memref<16x9x64xf32, #tpu.memory_space<vmem>>, vector<1x9x64xf32>
    %68 = vector.shape_cast %67 : vector<1x9x64xf32> to vector<9x64xf32>
    %cst_71 = arith.constant dense<0.000000e+00> : vector<9x32xf32>
    %69 = tpu.matmul %68, %21, %cst_71 {dimension_numbers = #tpu.dot_dimension_numbers<[1], [0], [0], [1], [0, 0, 1, 1], [], []>} : vector<9x64xf32>, vector<64x32xf32>, vector<9x32xf32> -> vector<9x32xf32>
    %70 = tpu.concatenate %24, %27, %30, %33, %36, %39, %42, %45, %48, %51, %54, %57, %60, %63, %66, %69 in 1 : vector<9x32xf32>, vector<9x32xf32>, vector<9x32xf32>, vector<9x32xf32>, vector<9x32xf32>, vector<9x32xf32>, vector<9x32xf32>, vector<9x32xf32>, vector<9x32xf32>, vector<9x32xf32>, vector<9x32xf32>, vector<9x32xf32>, vector<9x32xf32>, vector<9x32xf32>, vector<9x32xf32>, vector<9x32xf32> -> vector<9x512xf32>
    %c0_72 = arith.constant 0 : index
    %c0_73 = arith.constant 0 : index
    %71 = vector.load %arg6[%c0_72, %c0_73] : memref<512x64xf32, #tpu.memory_space<vmem>>, vector<512x64xf32>
    %cst_74 = arith.constant dense<0.000000e+00> : vector<9x64xf32>
    %72 = tpu.matmul %70, %71, %cst_74 {dimension_numbers = #tpu.dot_dimension_numbers<[1], [0], [0], [1], [0, 0, 1, 1], [], []>} : vector<9x512xf32>, vector<512x64xf32>, vector<9x64xf32> -> vector<9x64xf32>
    %c0_75 = arith.constant 0 : index
    %c0_76 = arith.constant 0 : index
    %73 = vector.load %arg7[%c0_75, %c0_76] : memref<1x64xf32, #tpu.memory_space<vmem>>, vector<1x64xf32>
    %74 = vector.broadcast %73 : vector<1x64xf32> to vector<9x64xf32>
    %75 = arith.addf %72, %74 : vector<9x64xf32>
    %cst_77 = arith.constant 0.000000e+00 : f32
    %76 = vector.broadcast %cst_77 : f32 to vector<9x64xf32>
    %77 = arith.maximumf %75, %76 : vector<9x64xf32>
    %c0_78 = arith.constant 0 : index
    %c0_79 = arith.constant 0 : index
    %c0_80 = arith.constant 0 : index
    %78 = vector.load %arg8[%c0_78, %c0_79, %c0_80] : memref<1x9x64xf32, #tpu.memory_space<vmem>>, vector<1x9x64xf32>
    %79 = vector.shape_cast %78 : vector<1x9x64xf32> to vector<9x64xf32>
    %80 = vector.shape_cast %77 : vector<9x64xf32> to vector<1x9x64xf32>
    tpu.vector_store %arg8[%c0_78, %c0_79, %c0_80], %80 {strides = array<i32>} : memref<1x9x64xf32, #tpu.memory_space<vmem>>, vector<1x9x64xf32>,
    return
  }
  func.func @transform_0(%arg0: i32) -> (i32, i32, i32) {
    %c0_i32 = arith.constant 0 : i32
    %c0_i32_0 = arith.constant 0 : i32
    %c0_i32_1 = arith.constant 0 : i32
    return %arg0, %c0_i32, %c0_i32_0 : i32, i32, i32
  }
  func.func @transform_1(%arg0: i32) -> (i32, i32, i32) {
    %c0_i32 = arith.constant 0 : i32
    %c0_i32_0 = arith.constant 0 : i32
    %c0_i32_1 = arith.constant 0 : i32
    %c0_i32_2 = arith.constant 0 : i32
    return %c0_i32, %c0_i32_0, %c0_i32_1 : i32, i32, i32
  }
  func.func @transform_2(%arg0: i32) -> (i32, i32) {
    %c0_i32 = arith.constant 0 : i32
    %c0_i32_0 = arith.constant 0 : i32
    %c0_i32_1 = arith.constant 0 : i32
    return %c0_i32, %c0_i32_0 : i32, i32
  }
  func.func @transform_3(%arg0: i32) -> (i32, i32) {
    %c0_i32 = arith.constant 0 : i32
    %c0_i32_0 = arith.constant 0 : i32
    %c0_i32_1 = arith.constant 0 : i32
    return %c0_i32, %c0_i32_0 : i32, i32
  }
  func.func @transform_4(%arg0: i32) -> (i32, i32, i32) {
    %c0_i32 = arith.constant 0 : i32
    %c0_i32_0 = arith.constant 0 : i32
    %c0_i32_1 = arith.constant 0 : i32
    %c0_i32_2 = arith.constant 0 : i32
    return %c0_i32, %c0_i32_0, %c0_i32_1 : i32, i32, i32
  }
  func.func @transform_5(%arg0: i32) -> (i32, i32) {
    %c0_i32 = arith.constant 0 : i32
    %c0_i32_0 = arith.constant 0 : i32
    %c0_i32_1 = arith.constant 0 : i32
    return %c0_i32, %c0_i32_0 : i32, i32
  }
  func.func @transform_6(%arg0: i32) -> (i32, i32) {
    %c0_i32 = arith.constant 0 : i32
    %c0_i32_0 = arith.constant 0 : i32
    %c0_i32_1 = arith.constant 0 : i32
    return %c0_i32, %c0_i32_0 : i32, i32
  }
  func.func @transform_7(%arg0: i32) -> (i32, i32, i32) {
    %c0_i32 = arith.constant 0 : i32
    %c0_i32_0 = arith.constant 0 : i32
    %c0_i32_1 = arith.constant 0 : i32
    return %arg0, %c0_i32, %c0_i32_0 : i32, i32, i32
  }
}

</mosaic_0001>

<bundles_post_ra>
// kernel: cnn_forward.1
= control target key start
LH: loop header
LB: loop body
LE: loop exit
PB: predicated region body
PF: predicated region fallthrough
CT: control target
= control target key end

     0   :  { %s3931_s24 = smov 0   ;;  %s4990_s0 = inlined_call_operand.vmem [shape: f32[2,81,64], index: 0, kind: input, shape index: {}]   ;;  %s4991_s1 = inlined_call_operand.vmem [shape: f32[4,64,81], index: 1, kind: input, shape index: {}]   ;;  %s4992_s2 = inlined_call_operand.vmem [shape: f32[256,32], index: 2, kind: input, shape index: {}]   ;;  %s4993_s3 = inlined_call_operand.vmem [shape: f32[1,32], index: 3, kind: input, shape index: {}]   ;;  %s4994_s4 = inlined_call_operand.vmem [shape: f32[16,9,64], index: 4, kind: input, shape index: {}]   ;;  %s4995_s5 = inlined_call_operand.vmem [shape: f32[512,64], index: 5, kind: input, shape index: {}]   ;;  %s4996_s6 = inlined_call_operand.vmem [shape: f32[1,64], index: 6, kind: input, shape index: {}]   ;;  %s4997_s7 = inlined_call_operand.vmem [shape: f32[2,9,64], index: 7, kind: output, shape index: {}]  }
   0x1 LB: > { %s2825_s25 = sadd.s32 4294967295, %s3886_s24   ;;  %p2829_p0 = scmp.ge.s32.totalorder %s3886_s24, 1  ;;  %s3886_s24 = sphi %s3931_s24, %s17_s24  }
   0x2   : > { %p237_p1 = scmp.lt.s32.totalorder %s3886_s24, 3 }
   0x4   : > { %p238_p2 = pnand %p2829_p0, %p237_p1 }
   0x5   : > { %p269_p3 = scmp.lt.s32.totalorder (!%p238_p2), %s2825_s25, 1  ;;  %s3888_s9 = smov (!%p238_p2), 64  }
   0x6   : > { %241 = sbr.rel (%p238_p2) target bundleno = 1284 (0x504), region = 48  ;;  %s3889_s16 = smov (!%p238_p2), 32  }
   0x7   : > { %s3890_s20 = smov (!%p238_p2), 96  }
   0xb   : > { %vm298_vm0 = vcmask 662528   ;;  %v2842_v0 = vld [vmem:[%s4991_s1 + $0x40] sm:$0xff]  ;;  %s4999_s25 = smov (!%p269_p3, %s2825_s25), 1  ;;  %vm323_vm1 = vcmask 1040384   ;;  %v2843_v13 = vld [vmem:[%s4991_s1 + $0x48] sm:$0xff]  ;;  %v2844_v14 = vld [vmem:[%s4991_s1 + $0x50] sm:$0xff] }
   0xc   : > { %3384 = vmatprep.mubr.msk.f32.mxu1 %vm298_vm0, %v2842_v0  ;;  %s3768_s28 = smul.u32 88, %s4999_s25  ;;  %v290_v1 = vld [vmem:[%s4991_s1] sm:$0xff]  ;;  %v291_v15 = vld [vmem:[%s4991_s1 + $0x8] sm:$0xff]  ;;  %v2845_v16 = vld [vmem:[%s4991_s1 + $0x58] sm:$0xff]  ;;  %vm910_vm2 = vcmask 523264   ;;  %vm2518_vm3 = vcmask 261120  }
   0xd   : > { %3350 = vmatprep.mubr.msk.f32.mxu0 %vm298_vm0, %v290_v1  ;;  %v2846_v17 = vld [vmem:[%s4991_s1 + $0x60] sm:$0xff]  ;;  %v2847_v18 = vld [vmem:[%s4991_s1 + $0x68] sm:$0xff]  ;;  %v2848_v19 = vld [vmem:[%s4991_s1 + $0x70] sm:$0xff]  ;;  %vm2523_vm4 = vcmask 785408   ;;  %s2959_s13 = sshll.u32 %s4999_s25, 4  ;;  %vm2768_vm5 = vcmask 516096  }
   0xe   : > { %s3952_s10 = scalar_lea.vmem %s4990_s0, %s3768_s28  ;;  %v2849_v20 = vld [vmem:[%s4991_s1 + $0x78] sm:$0xff]  ;;  %v2876_v21 = vld [vmem:[%s4991_s1 + $0xc0] sm:$0xff]  ;;  %v292_v22 = vld [vmem:[%s4991_s1 + $0x10] sm:$0xff] }
   0xf   : > { %v3956_v2 = vld [vmem:[%s3952_s10 + $0x50] sm:$0x1]  ;;  %v3959_v3 = vld [vmem:[%s3952_s10 + $0x48] sm:$0xff]  ;;  %v3968_v4 = vld [vmem:[%s3952_s10 + $0x40] sm:$0xff] }
  0x10   : > { %3362 = vmatprep.subr.msk.mxu1 %vm323_vm1, %v3956_v2  ;;  %3328 = vmatprep.subr.msk.mxu0 %vm323_vm1, %v3956_v2  ;;  %v3976_v5 = vld [vmem:[%s3952_s10 + $0x38] sm:$0xff]  ;;  %v3983_v6 = vld [vmem:[%s3952_s10 + $0x30] sm:$0xff]  ;;  %v3990_v7 = vld [vmem:[%s3952_s10 + $0x28] sm:$0xff] }
  0x11   : > { %3363 = vmatpush3.msk.msra.mxu1 %vm323_vm1, %v3956_v2  ;;  %3329 = vmatpush3.msk.msra.mxu0 %vm323_vm1, %v3956_v2  ;;  %v3997_v8 = vld [vmem:[%s3952_s10 + $0x20] sm:$0xff]  ;;  %v4004_v9 = vld [vmem:[%s3952_s10 + $0x18] sm:$0xff]  ;;  %v4011_v10 = vld [vmem:[%s3952_s10 + $0x10] sm:$0xff] }
  0x12   : > { %3364 = vmatprep.subr.mxu1 %v3959_v3  ;;  %3330 = vmatprep.subr.mxu0 %v3959_v3  ;;  %v4018_v11 = vld [vmem:[%s3952_s10 + $0x8] sm:$0xff]  ;;  %v4025_v12 = vld [vmem:[%s3952_s10] sm:$0xff]  ;;  %v293_v23 = vld [vmem:[%s4991_s1 + $0x18] sm:$0xff] }
  0x13   : > { %3365 = vmatpush3.msra.mxu1 %v3959_v3  ;;  %3331 = vmatpush3.msra.mxu0 %v3959_v3  ;;  %v2877_v24 = vld [vmem:[%s4991_s1 + $0xc8] sm:$0xff]  ;;  %v2878_v25 = vld [vmem:[%s4991_s1 + $0xd0] sm:$0xff]  ;;  %v294_v26 = vld [vmem:[%s4991_s1 + $0x20] sm:$0xff] }
  0x14   : > { %3366 = vmatprep.subr.mxu1 %v3968_v4  ;;  %3332 = vmatprep.subr.mxu0 %v3968_v4  ;;  %v295_v27 = vld [vmem:[%s4991_s1 + $0x28] sm:$0xff]  ;;  %v2879_v28 = vld [vmem:[%s4991_s1 + $0xd8] sm:$0xff]  ;;  %v2880_v29 = vld [vmem:[%s4991_s1 + $0xe0] sm:$0xff] }
  0x15   : > { %3367 = vmatpush3.msra.mxu1 %v3968_v4  ;;  %3333 = vmatpush3.msra.mxu0 %v3968_v4  ;;  %v296_v30 = vld [vmem:[%s4991_s1 + $0x30] sm:$0xff]  ;;  %v297_v31 = vld [vmem:[%s4991_s1 + $0x38] sm:$0xff]  ;;  %v2881_v32 = vld [vmem:[%s4991_s1 + $0xe8] sm:$0xff] }
  0x16   : > { %3368 = vmatprep.subr.mxu1 %v3976_v5  ;;  %3334 = vmatprep.subr.mxu0 %v3976_v5  ;;  %v2882_v33 = vld [vmem:[%s4991_s1 + $0xf0] sm:$0xff]  ;;  %v2859_v34 = vld [vmem:[%s4991_s1 + $0x80] sm:$0xff]  ;;  %v2860_v35 = vld [vmem:[%s4991_s1 + $0x88] sm:$0xff] }
  0x17   : > { %3369 = vmatpush3.msra.mxu1 %v3976_v5  ;;  %3335 = vmatpush3.msra.mxu0 %v3976_v5  ;;  %v2883_v36 = vld [vmem:[%s4991_s1 + $0xf8] sm:$0xff]  ;;  %v2861_v37 = vld [vmem:[%s4991_s1 + $0x90] sm:$0xff]  ;;  %v2863_v39 = vld [vmem:[%s4991_s1 + $0xa0] sm:$0xff] }
  0x18   : > { %3370 = vmatprep.subr.mxu1 %v3983_v6  ;;  %3336 = vmatprep.subr.mxu0 %v3983_v6  ;;  %v2862_v38 = vld [vmem:[%s4991_s1 + $0x98] sm:$0xff]  ;;  %v2864_v40 = vld [vmem:[%s4991_s1 + $0xa8] sm:$0xff]  ;;  %v2865_v41 = vld [vmem:[%s4991_s1 + $0xb0] sm:$0xff] }
  0x19   : > { %3371 = vmatpush3.msra.mxu1 %v3983_v6  ;;  %3337 = vmatpush3.msra.mxu0 %v3983_v6  ;;  %v2866_v42 = vld [vmem:[%s4991_s1 + $0xb8] sm:$0xff]  ;;  %v957_v45 = vld [vmem:[%s4992_s2 + $0xf0] sm:$0xff]  ;;  %v956_v47 = vld [vmem:[%s4992_s2 + $0xe8] sm:$0xff] }
  0x1a   : > { %3372 = vmatprep.subr.mxu1 %v3990_v7  ;;  %3338 = vmatprep.subr.mxu0 %v3990_v7  ;;  %v958_v43 = vld [vmem:[%s4992_s2 + $0xf8] sm:$0xff]  ;;  %v941_v46 = vld [vmem:[%s4992_s2 + $0x70] sm:$0xff]  ;;  %v940_v48 = vld [vmem:[%s4992_s2 + $0x68] sm:$0xff] }
  0x1b   : > { %3373 = vmatpush3.msra.mxu1 %v3990_v7  ;;  %3339 = vmatpush3.msra.mxu0 %v3990_v7  ;;  %v942_v44 = vld [vmem:[%s4992_s2 + $0x78] sm:$0xff]  ;;  %v955_v49 = vld [vmem:[%s4992_s2 + $0xe0] sm:$0xff]  ;;  %v953_v53 = vld [vmem:[%s4992_s2 + $0xd0] sm:$0xff] }
  0x1c   : > { %3374 = vmatprep.subr.mxu1 %v3997_v8  ;;  %3340 = vmatprep.subr.mxu0 %v3997_v8  ;;  %v939_v50 = vld [vmem:[%s4992_s2 + $0x60] sm:$0xff]  ;;  %v954_v51 = vld [vmem:[%s4992_s2 + $0xd8] sm:$0xff]  ;;  %v937_v54 = vld [vmem:[%s4992_s2 + $0x50] sm:$0xff] }
  0x1d   : > { %3375 = vmatpush3.msra.mxu1 %v3997_v8  ;;  %3341 = vmatpush3.msra.mxu0 %v3997_v8  ;;  %v938_v52 = vld [vmem:[%s4992_s2 + $0x58] sm:$0xff]  ;;  %v952_v55 = vld [vmem:[%s4992_s2 + $0xc8] sm:$0xff]  ;;  %v951_v57 = vld [vmem:[%s4992_s2 + $0xc0] sm:$0xff] }
  0x1e   : > { %3376 = vmatprep.subr.mxu1 %v4004_v9  ;;  %3342 = vmatprep.subr.mxu0 %v4004_v9  ;;  %v936_v56 = vld [vmem:[%s4992_s2 + $0x48] sm:$0xff]  ;;  %v935_v58 = vld [vmem:[%s4992_s2 + $0x40] sm:$0xff]  ;;  %v950_v59 = vld [vmem:[%s4992_s2 + $0xb8] sm:$0xff] }
  0x1f   : > { %3377 = vmatpush3.msra.mxu1 %v4004_v9  ;;  %3343 = vmatpush3.msra.mxu0 %v4004_v9  ;;  %v934_v60 = vld [vmem:[%s4992_s2 + $0x38] sm:$0xff]  ;;  %v949_v61 = vld [vmem:[%s4992_s2 + $0xb0] sm:$0xff]  ;;  %v948_v63 = vld [vmem:[%s4992_s2 + $0xa8] sm:$0xff] }
  0x20   : > { %3378 = vmatprep.subr.mxu1 %v4011_v10  ;;  %3344 = vmatprep.subr.mxu0 %v4011_v10  ;;  %v933_v62 = vld [vmem:[%s4992_s2 + $0x30] sm:$0xff]  ;;  %v932_v0 = vld [vmem:[%s4992_s2 + $0x28] sm:$0xff]  ;;  %v947_v1 = vld [vmem:[%s4992_s2 + $0xa0] sm:$0xff] }
  0x21   : > { %3379 = vmatpush3.msra.mxu1 %v4011_v10  ;;  %3345 = vmatpush3.msra.mxu0 %v4011_v10 }
  0x22   : > { %3380 = vmatprep.subr.mxu1 %v4018_v11  ;;  %3346 = vmatprep.subr.mxu0 %v4018_v11 }
  0x23   : > { %3381 = vmatpush3.msra.mxu1 %v4018_v11  ;;  %3347 = vmatpush3.msra.mxu0 %v4018_v11 }
  0x24   : > { %3382 = vmatprep.subr.mxu1 %v4025_v12  ;;  %3348 = vmatprep.subr.mxu0 %v4025_v12 }
  0x25   : > { %3383 = vmatpush3.msra.mxu1 %v4025_v12  ;;  %3349 = vmatpush3.msra.mxu0 %v4025_v12 }
  0x26   : > { %3385 = vmatmul.mubr.msk.f32.vlgmr.msra.gmra.mxu1 %vm298_vm0, %v2843_v13  ;;  %3430 = vmatprep.subr.msk.mxu1 %vm323_vm1, %v3956_v2  ;;  %v944_v13 = vld [vmem:[%s4992_s2 + $0x88] sm:$0xff] }
  0x27   : > { %3431 = vmatpush3.msk.msra.mxu1 %vm323_vm1, %v3956_v2  ;;  %3387 = vmatprep.mubr.msk.f32.mxu1 %vm298_vm0, %v2844_v14  ;;  %v928_v14 = vld [vmem:[%s4992_s2 + $0x8] sm:$0xff] }
  0x28   : > { %3432 = vmatprep.subr.mxu1 %v3959_v3  ;;  %3396 = vmatprep.subr.msk.mxu0 %vm323_vm1, %v3956_v2 }
  0x29   : > { %3433 = vmatpush3.msra.mxu1 %v3959_v3  ;;  %3351 = vmatmul.mubr.msk.f32.vlgmr.msra.gmra.mxu0 %vm298_vm0, %v291_v15  ;;  %v943_v15 = vld [vmem:[%s4992_s2 + $0x80] sm:$0xff] }
  0x2a   : > { %3434 = vmatprep.subr.mxu1 %v3968_v4  ;;  %3388 = vmatmul.mubr.msk.f32.gmra.mxu1 %vm298_vm0, %v2845_v16 }
  0x2b   : > { %3435 = vmatpush3.msra.mxu1 %v3968_v4  ;;  %3390 = vmatprep.mubr.msk.f32.mxu1 %vm298_vm0, %v2846_v17  ;;  %v927_v17 = vld [vmem:[%s4992_s2] sm:$0xff] }
  0x2c   : > { %3436 = vmatprep.subr.mxu1 %v3976_v5  ;;  %3397 = vmatpush3.msk.msra.mxu0 %vm323_vm1, %v3956_v2  ;;  %v931_v2 = vld [vmem:[%s4992_s2 + $0x20] sm:$0xff] }
  0x2d   : > { %3437 = vmatpush3.msra.mxu1 %v3976_v5  ;;  %3398 = vmatprep.subr.mxu0 %v3959_v3 }
  0x2e   : > { %3438 = vmatprep.subr.mxu1 %v3983_v6  ;;  %3391 = vmatmul.mubr.msk.f32.gmra.mxu1 %vm298_vm0, %v2847_v18 }
  0x2f   : > { %3439 = vmatpush3.msra.mxu1 %v3983_v6  ;;  %3393 = vmatprep.mubr.msk.f32.mxu1 %vm298_vm0, %v2848_v19 }
  0x30   : > { %3440 = vmatprep.subr.mxu1 %v3990_v7  ;;  %3399 = vmatpush3.msra.mxu0 %v3959_v3  ;;  %v946_v3 = vld [vmem:[%s4992_s2 + $0x98] sm:$0xff] }
  0x31   : > { %3441 = vmatpush3.msra.mxu1 %v3990_v7  ;;  %3400 = vmatprep.subr.mxu0 %v3968_v4 }
  0x32   : > { %3442 = vmatprep.subr.mxu1 %v3997_v8  ;;  %3394 = vmatmul.mubr.msk.f32.gmra.mxu1 %vm298_vm0, %v2849_v20 }
  0x33   : > { %3443 = vmatpush3.msra.mxu1 %v3997_v8  ;;  %3452 = vmatprep.mubr.msk.f32.mxu1 %vm298_vm0, %v2876_v21 }
  0x34   : > { %3444 = vmatprep.subr.mxu1 %v4004_v9  ;;  %3401 = vmatpush3.msra.mxu0 %v3968_v4  ;;  %v930_v4 = vld [vmem:[%s4992_s2 + $0x18] sm:$0xff] }
  0x35   : > { %3445 = vmatpush3.msra.mxu1 %v4004_v9  ;;  %3402 = vmatprep.subr.mxu0 %v3976_v5 }
  0x36   : > { %3446 = vmatprep.subr.mxu1 %v4011_v10  ;;  %3403 = vmatpush3.msra.mxu0 %v3976_v5  ;;  %v945_v5 = vld [vmem:[%s4992_s2 + $0x90] sm:$0xff] }
  0x37   : > { %3447 = vmatpush3.msra.mxu1 %v4011_v10  ;;  %3404 = vmatprep.subr.mxu0 %v3983_v6 }
  0x38   : > { %3448 = vmatprep.subr.mxu1 %v4018_v11  ;;  %3353 = vmatprep.mubr.msk.f32.mxu0 %vm298_vm0, %v292_v22 }
  0x39   : > { %3449 = vmatpush3.msra.mxu1 %v4018_v11  ;;  %3405 = vmatpush3.msra.mxu0 %v3983_v6 }
  0x3a   : > { %3450 = vmatprep.subr.mxu1 %v4025_v12  ;;  %3354 = vmatmul.mubr.msk.f32.gmra.mxu0 %vm298_vm0, %v293_v23 }
  0x3b   : > { %3451 = vmatpush3.msra.mxu1 %v4025_v12  ;;  %3406 = vmatprep.subr.mxu0 %v3990_v7 }
  0x3c   : > { %3453 = vmatmul.mubr.msk.f32.vlgmr.msra.gmra.mxu1 %vm298_vm0, %v2877_v24  ;;  %3407 = vmatpush3.msra.mxu0 %v3990_v7 }
  0x3d   : > { %3455 = vmatprep.mubr.msk.f32.mxu1 %vm298_vm0, %v2878_v25  ;;  %3408 = vmatprep.subr.mxu0 %v3997_v8 }
  0x3e   : > { %3356 = vmatprep.mubr.msk.f32.mxu0 %vm298_vm0, %v294_v26  ;;  %3409 = vmatpush3.msra.mxu0 %v3997_v8 }
  0x3f   : > { %3357 = vmatmul.mubr.msk.f32.gmra.mxu0 %vm298_vm0, %v295_v27  ;;  %3410 = vmatprep.subr.mxu0 %v4004_v9 }
  0x40   : > { %3456 = vmatmul.mubr.msk.f32.gmra.mxu1 %vm298_vm0, %v2879_v28  ;;  %3411 = vmatpush3.msra.mxu0 %v4004_v9 }
  0x41   : > { %3458 = vmatprep.mubr.msk.f32.mxu1 %vm298_vm0, %v2880_v29  ;;  %3412 = vmatprep.subr.mxu0 %v4011_v10 }
  0x42   : > { %3359 = vmatprep.mubr.msk.f32.mxu0 %vm298_vm0, %v296_v30  ;;  %3413 = vmatpush3.msra.mxu0 %v4011_v10 }
  0x43   : > { %3360 = vmatmul.mubr.msk.f32.gmra.mxu0 %vm298_vm0, %v297_v31  ;;  %3414 = vmatprep.subr.mxu0 %v4018_v11 }
  0x44   : > { %3459 = vmatmul.mubr.msk.f32.gmra.mxu1 %vm298_vm0, %v2881_v32  ;;  %3415 = vmatpush3.msra.mxu0 %v4018_v11 }
  0x45   : > { %3461 = vmatprep.mubr.msk.f32.mxu1 %vm298_vm0, %v2882_v33  ;;  %3416 = vmatprep.subr.mxu0 %v4025_v12 }
  0x46   : > { %3417 = vmatpush3.msra.mxu0 %v4025_v12  ;;  %3418 = vmatprep.mubr.msk.f32.mxu0 %vm298_vm0, %v2859_v34  ;;  %v929_v12 = vld [vmem:[%s4992_s2 + $0x10] sm:$0xff] }
  0x47   : > { %3419 = vmatmul.mubr.msk.f32.vlgmr.msra.gmra.mxu0 %vm298_vm0, %v2860_v35  ;;  %3036 = vmatprep.subr.mxu0 %v958_v43 }
  0x48   : > { %3462 = vmatmul.mubr.msk.f32.gmra.mxu1 %vm298_vm0, %v2883_v36  ;;  %3421 = vmatprep.mubr.msk.f32.mxu0 %vm298_vm0, %v2861_v37 }
  0x49   : > { %3037 = vmatpush3.msra.mxu0 %v942_v44 }
  0x4a   : > { %3038 = vmatprep.subr.mxu0 %v957_v45 }
  0x4b   : > { %3422 = vmatmul.mubr.msk.f32.gmra.mxu0 %vm298_vm0, %v2862_v38 }
  0x4c   : > { %3424 = vmatprep.mubr.msk.f32.mxu0 %vm298_vm0, %v2863_v39  ;;  %3039 = vmatpush3.msra.mxu0 %v941_v46 }
  0x4d   : > { %3040 = vmatprep.subr.mxu0 %v956_v47 }
  0x4e   : > { %3041 = vmatpush3.msra.mxu0 %v940_v48 }
  0x4f   : > { %3425 = vmatmul.mubr.msk.f32.gmra.mxu0 %vm298_vm0, %v2864_v40  ;;  %3042 = vmatprep.subr.mxu0 %v955_v49 }
  0x50   : > { %3427 = vmatprep.mubr.msk.f32.mxu0 %vm298_vm0, %v2865_v41  ;;  %3043 = vmatpush3.msra.mxu0 %v939_v50 }
  0x51   : > { %3044 = vmatprep.subr.mxu0 %v954_v51 }
  0x52   : > { %3045 = vmatpush3.msra.mxu0 %v938_v52 }
  0x53   : > { %3428 = vmatmul.mubr.msk.f32.gmra.mxu0 %vm298_vm0, %v2866_v42  ;;  %3046 = vmatprep.subr.mxu0 %v953_v53 }
  0x54   : > { %3047 = vmatpush3.msra.mxu0 %v937_v54 }
  0x55   : > { %3048 = vmatprep.subr.mxu0 %v952_v55 }
  0x56   : > { %3049 = vmatpush3.msra.mxu0 %v936_v56 }
  0x57   : > { %3050 = vmatprep.subr.mxu0 %v951_v57 }
  0x58   : > { %3051 = vmatpush3.msra.mxu0 %v935_v58 }
  0x59   : > { %3052 = vmatprep.subr.mxu0 %v950_v59 }
  0x5a   : > { %3053 = vmatpush3.msra.mxu0 %v934_v60 }
  0x5b   : > { %3054 = vmatprep.subr.mxu0 %v949_v61 }
  0x5c   : > { %3055 = vmatpush3.msra.mxu0 %v933_v62 }
  0x5d   : > { %3056 = vmatprep.subr.mxu0 %v948_v63 }
  0x5e   : > { %3057 = vmatpush3.msra.mxu0 %v932_v0 }
  0x5f   : > { %3058 = vmatprep.subr.mxu0 %v947_v1 }
  0x60   : > { %3059 = vmatpush3.msra.mxu0 %v931_v2 }
  0x61   : > { %3060 = vmatprep.subr.mxu0 %v946_v3 }
  0x62   : > { %3061 = vmatpush3.msra.mxu0 %v930_v4 }
  0x63   : > { %3062 = vmatprep.subr.mxu0 %v945_v5 }
  0x64   : > { %3063 = vmatpush3.msra.mxu0 %v929_v12 }
  0x65   : > { %3064 = vmatprep.subr.mxu0 %v944_v13 }
  0x66   : > { %3065 = vmatpush3.msra.mxu0 %v928_v14 }
  0x67   : > { %3066 = vmatprep.subr.mxu0 %v943_v15 }
  0x68   : > { %3067 = vmatpush3.msra.mxu0 %v927_v17 }
  0xe6   : > { %v3386_v6 = vpop.f32.mrf.mxu1 }
  0xe8   : > { %v531_v7 = vpop.f32.mrf.mxu1 }
  0xe9   : > { %v3352_v35 = vpop.f32.mrf.mxu0 }
  0xea   : > { %v3389_v8 = vpop.f32.mrf.mxu1 }
  0xeb   : > { %v393_v36 = vpop.f32.mrf.mxu0 }
  0xec   : > { %v541_v9 = vpop.f32.mrf.mxu1 }
  0xee   : > { %v3392_v10 = vpop.f32.mrf.mxu1 }
  0xf0   : > { %v551_v11 = vpop.f32.mrf.mxu1 }
  0xf2   : > { %v3395_v16 = vpop.f32.mrf.mxu1 }
  0xf4   : > { %v561_v18 = vpop.f32.mrf.mxu1 }
  0xfa   : > { %v3355_v37 = vpop.f32.mrf.mxu0 }
  0xfc   : > { %v3454_v19 = vpop.f32.mrf.mxu1  ;;  %v403_v38 = vpop.f32.mrf.mxu0 }
  0xfd   : > { %v3785_v24 = vpack.i.bf16 %v3386_v6, %v3454_v19 }
  0xfe   : > { %v807_v20 = vpop.f32.mrf.mxu1 }
  0xff   : > { %v3780_v21 = vpack.i.bf16 %v531_v7, %v807_v20  ;;  %v3358_v39 = vpop.f32.mrf.mxu0 }
 0x100   : > { %v3457_v22 = vpop.f32.mrf.mxu1 }
 0x101   : > { %3781 = vrot.lane.b32.xlu0 %v3780_v21, %s3888_s9  ;;  %v3795_v28 = vpack.i.bf16 %v3389_v8, %v3457_v22  ;;  %v413_v40 = vpop.f32.mrf.mxu0 }
 0x102   : > { %v817_v23 = vpop.f32.mrf.mxu1 }
 0x103   : > { %v3790_v25 = vpack.i.bf16 %v541_v9, %v817_v23  ;;  %v4308_v41 = vpop.f32.mrf.mxu0 }
 0x104   : > { %v3460_v26 = vpop.f32.mrf.mxu1 }
 0x105   : > { %3786 = vrot.lane.b32.xlu0 %v3785_v24, %s3888_s9  ;;  %3791 = vrot.lane.b32.xlu1 %v3790_v25, %s3888_s9  ;;  %v3805_v32 = vpack.i.bf16 %v3392_v10, %v3460_v26  ;;  %v423_v42 = vpop.f32.mrf.mxu0 }
 0x106   : > { %v827_v27 = vpop.f32.mrf.mxu1 }
 0x107   : > { %v3800_v29 = vpack.i.bf16 %v551_v11, %v827_v27  ;;  %v3420_v43 = vpop.f32.mrf.mxu0  ;;  %v1079_v27 = vld [vmem:[%s4994_s4] sm:$0xff] }
 0x108   : > { %v3463_v30 = vpop.f32.mrf.mxu1  ;;  %3480 = vmatprep.mubr.msk.f32.mxu1 %vm910_vm2, %v1079_v27  ;;  %v2945_v27 = vld [vmem:[%s4994_s4 + $0xd8] sm:$0x1] }
 0x109   : > { %3796 = vrot.lane.b32.xlu1 %v3795_v28, %s3888_s9  ;;  %3801 = vrot.lane.b32.xlu0 %v3800_v29, %s3888_s9  ;;  %v3815_v34 = vpack.i.bf16 %v3395_v16, %v3463_v30  ;;  %v669_v45 = vpop.f32.mrf.mxu0  ;;  %v2904_v28 = vld [vmem:[%s4994_s4 + $0x30] sm:$0xff] }
 0x10a   : > { %v837_v31 = vpop.f32.mrf.mxu1 }
 0x10b   : > { %v3810_v33 = vpack.i.bf16 %v561_v18, %v837_v31  ;;  %v3423_v48 = vpop.f32.mrf.mxu0 }
 0x10d   : > { %3806 = vrot.lane.b32.xlu1 %v3805_v32, %s3888_s9  ;;  %3811 = vrot.lane.b32.xlu0 %v3810_v33, %s3888_s9  ;;  %v679_v56 = vpop.f32.mrf.mxu0 }
 0x10f   : > { %v3426_v0 = vpop.f32.mrf.mxu0 }
 0x111   : > { %3816 = vrot.lane.b32.xlu1 %v3815_v34, %s3888_s9  ;;  %v689_v5 = vpop.f32.mrf.mxu0 }
 0x113   : > { %v3429_v12 = vpop.f32.mrf.mxu0 }
 0x115   : > { %v699_v17 = vpop.f32.mrf.mxu0 }
 0x173   : > { %v3782_v44 = vpop.permute.xlu0 %3781 }
 0x174   : > { %v3784_v46 = vunpack.i.h.bf16 %v3782_v44  ;;  %v3783_v47 = vunpack.i.l.bf16 %v3782_v44 }
 0x176   : > { %v919_v49 = vsel %vm910_vm2, %v669_v45, %v3783_v47  ;;  %v911_v50 = vsel %vm910_vm2, %v393_v36, %v3784_v46 }
 0x177   : > { %v3787_v51 = vpop.permute.xlu0 %3786  ;;  %v3792_v52 = vpop.permute.xlu1 %3791  ;;  %1030 = vmatprep.mubr.f32.mxu0 %v919_v49 }
 0x178   : > { %v3789_v53 = vunpack.i.h.bf16 %v3787_v51  ;;  %v3788_v54 = vunpack.i.l.bf16 %v3787_v51  ;;  %v3793_v55 = vunpack.i.l.bf16 %v3792_v52  ;;  %1031 = vmatmul.mubr.f32.vlgmr.msra.gmra.mxu0 %v911_v50  ;;  %v3794_v59 = vunpack.i.h.bf16 %v3792_v52 }
 0x17a   : > { %v920_v57 = vsel %vm910_vm2, %v3420_v43, %v3788_v54  ;;  %v912_v58 = vsel %vm910_vm2, %v3352_v35, %v3789_v53  ;;  %v921_v62 = vsel %vm910_vm2, %v679_v56, %v3793_v55  ;;  %v913_v2 = vsel %vm910_vm2, %v403_v38, %v3794_v59 }
 0x17b   : > { %v3797_v60 = vpop.permute.xlu1 %3796  ;;  %1035 = vmatprep.mubr.f32.mxu0 %v920_v57  ;;  %v3802_v63 = vpop.permute.xlu0 %3801 }
 0x17c   : > { %v3798_v61 = vunpack.i.l.bf16 %v3797_v60  ;;  %1036 = vmatmul.mubr.f32.gmra.mxu0 %v912_v58  ;;  %v3799_v1 = vunpack.i.h.bf16 %v3797_v60  ;;  %v3803_v3 = vunpack.i.l.bf16 %v3802_v63  ;;  %v3804_v7 = vunpack.i.h.bf16 %v3802_v63 }
 0x17d   : > { %1040 = vmatprep.mubr.f32.mxu0 %v921_v62 }
 0x17e   : > { %v922_v4 = vsel %vm910_vm2, %v3423_v48, %v3798_v61  ;;  %v914_v8 = vsel %vm910_vm2, %v3355_v37, %v3799_v1  ;;  %v923_v10 = vsel %vm910_vm2, %v689_v5, %v3803_v3  ;;  %v915_v14 = vsel %vm910_vm2, %v413_v40, %v3804_v7  ;;  %v2893_v48 = vld [vmem:[%s4993_s3] ss:$0 sm:$0xff]  ;;  %v2905_v7 = vld [vmem:[%s4994_s4 + $0x38] sm:$0x1] }
 0x17f   : > { %v3807_v6 = vpop.permute.xlu1 %3806  ;;  %v3812_v11 = vpop.permute.xlu0 %3811 }
 0x180   : > { %1041 = vmatmul.mubr.f32.gmra.mxu0 %v913_v2  ;;  %v3808_v9 = vunpack.i.l.bf16 %v3807_v6  ;;  %v3809_v13 = vunpack.i.h.bf16 %v3807_v6  ;;  %v3813_v15 = vunpack.i.l.bf16 %v3812_v11  ;;  %v3814_v19 = vunpack.i.h.bf16 %v3812_v11  ;;  %v1080_v6 = vld [vmem:[%s4994_s4 + $0x8] sm:$0x1]  ;;  %v2913_v11 = vld [vmem:[%s4994_s4 + $0x58] sm:$0x1] }
 0x181   : > { %1045 = vmatprep.mubr.f32.mxu0 %v922_v4 }
 0x182   : > { %v924_v16 = vsel %vm910_vm2, %v3426_v0, %v3808_v9  ;;  %v916_v20 = vsel %vm910_vm2, %v3358_v39, %v3809_v13  ;;  %v925_v22 = vsel %vm910_vm2, %v699_v17, %v3813_v15  ;;  %v917_v24 = vsel %vm910_vm2, %v423_v42, %v3814_v19  ;;  %v2912_v9 = vld [vmem:[%s4994_s4 + $0x50] sm:$0xff]  ;;  %v2921_v15 = vld [vmem:[%s4994_s4 + $0x78] sm:$0x1]  ;;  %v2909_v17 = vld [vmem:[%s4994_s4 + $0x48] sm:$0x1] }
 0x183   : > { %v3817_v18 = vpop.permute.xlu1 %3816  ;;  %v2920_v13 = vld [vmem:[%s4994_s4 + $0x70] sm:$0xff]  ;;  %v2929_v19 = vld [vmem:[%s4994_s4 + $0x98] sm:$0x1] }
 0x184   : > { %1046 = vmatmul.mubr.f32.gmra.mxu0 %v914_v8  ;;  %v3818_v21 = vunpack.i.l.bf16 %v3817_v18  ;;  %v3819_v23 = vunpack.i.h.bf16 %v3817_v18  ;;  %v2896_v8 = vld [vmem:[%s4994_s4 + $0x10] sm:$0xff] }
 0x185   : > { %1050 = vmatprep.mubr.f32.mxu0 %v923_v10  ;;  %v2897_v10 = vld [vmem:[%s4994_s4 + $0x18] sm:$0x1]  ;;  %v2928_v18 = vld [vmem:[%s4994_s4 + $0x90] sm:$0xff] }
 0x186   : > { %v926_v25 = vsel %vm910_vm2, %v3429_v12, %v3818_v21  ;;  %v918_v26 = vsel %vm910_vm2, %v4308_v41, %v3819_v23  ;;  %v2900_v12 = vld [vmem:[%s4994_s4 + $0x20] sm:$0xff]  ;;  %v2917_v21 = vld [vmem:[%s4994_s4 + $0x68] sm:$0x1]  ;;  %v2937_v23 = vld [vmem:[%s4994_s4 + $0xb8] sm:$0x1] }
 0x188   : > { %1051 = vmatmul.mubr.f32.gmra.mxu0 %v915_v14  ;;  %v2901_v14 = vld [vmem:[%s4994_s4 + $0x28] sm:$0x1] }
 0x189   : > { %1055 = vmatprep.mubr.f32.mxu0 %v924_v16  ;;  %v2908_v16 = vld [vmem:[%s4994_s4 + $0x40] sm:$0xff] }
 0x18c   : > { %1056 = vmatmul.mubr.f32.gmra.mxu0 %v916_v20  ;;  %v2916_v20 = vld [vmem:[%s4994_s4 + $0x60] sm:$0xff] }
 0x18d   : > { %1060 = vmatprep.mubr.f32.mxu0 %v925_v22  ;;  %v2936_v22 = vld [vmem:[%s4994_s4 + $0xb0] sm:$0xff] }
 0x190   : > { %1061 = vmatmul.mubr.f32.gmra.mxu0 %v917_v24  ;;  %v2924_v24 = vld [vmem:[%s4994_s4 + $0x80] sm:$0xff] }
 0x191   : > { %1065 = vmatprep.mubr.f32.mxu0 %v926_v25  ;;  %v2944_v25 = vld [vmem:[%s4994_s4 + $0xd0] sm:$0xff] }
 0x194   : > { %1066 = vmatmul.mubr.f32.gmra.mxu0 %v918_v26  ;;  %v2925_v26 = vld [vmem:[%s4994_s4 + $0x88] sm:$0x1] }
 0x195   : > { %3537 = vmatprep.mubr.msk.f32.mxu0 %vm910_vm2, %v2904_v28  ;;  %v2932_v28 = vld [vmem:[%s4994_s4 + $0xa0] sm:$0xff] }
 0x238   : > { %v3068_v29 = vpop.f32.mrf.mxu0 }
 0x23a   : > { %v3069_v30 = vpop.f32.mrf.mxu0 }
 0x23b   : > { %v3070_v61 = vadd.f32 %v3069_v30, %v3068_v29  ;;  %v2952_v29 = vld [vmem:[%s4994_s4 + $0xf0] sm:$0xff]  ;;  %v2933_v30 = vld [vmem:[%s4994_s4 + $0xa8] sm:$0x1] }
 0x23c   : > { %v3071_v31 = vpop.f32.mrf.mxu0 }
 0x23d   : > { %v1033_v2 = vadd.f32 %v3070_v61, %v2893_v48  ;;  %v2569_v61 = vld [vmem:[%s4995_s5 + $0xc8] sm:$0xff] }
 0x23e   : > { %v3072_v32 = vpop.f32.mrf.mxu0 }
 0x23f   : > { %v3073_v58 = vadd.f32 %v3072_v32, %v3071_v31  ;;  %v4376_v5 = vmax.f32 %v1033_v2, 0.0  ;;  %v2953_v31 = vld [vmem:[%s4994_s4 + $0xf8] sm:$0x1]  ;;  %v2940_v32 = vld [vmem:[%s4994_s4 + $0xc0] sm:$0xff] }
 0x240   : > { %v3074_v33 = vpop.f32.mrf.mxu0  ;;  %v2567_v2 = vld [vmem:[%s4995_s5 + $0xb8] sm:$0xff] }
 0x241   : > { %v1038_v0 = vadd.f32 %v3073_v58, %v2893_v48 }
 0x242   : > { %v3075_v34 = vpop.f32.mrf.mxu0 }
 0x243   : > { %v3076_v55 = vadd.f32 %v3075_v34, %v3074_v33  ;;  %v4370_v4 = vmax.f32 %v1038_v0, 0.0  ;;  %v2941_v33 = vld [vmem:[%s4994_s4 + $0xc8] sm:$0x1]  ;;  %v2948_v34 = vld [vmem:[%s4994_s4 + $0xe0] sm:$0xff] }
 0x244   : > { %v3077_v35 = vpop.f32.mrf.mxu0  ;;  %v2568_v0 = vld [vmem:[%s4995_s5 + $0xc0] sm:$0xff] }
 0x245   : > { %v1043_v62 = vadd.f32 %v3076_v55, %v2893_v48  ;;  %v2571_v55 = vld [vmem:[%s4995_s5 + $0xd8] sm:$0xff] }
 0x246   : > { %v3078_v36 = vpop.f32.mrf.mxu0 }
 0x247   : > { %v3079_v52 = vadd.f32 %v3078_v36, %v3077_v35  ;;  %v4364_v3 = vmax.f32 %v1043_v62, 0.0  ;;  %v2949_v35 = vld [vmem:[%s4994_s4 + $0xe8] sm:$0x1] }
 0x248   : > { %v3080_v37 = vpop.f32.mrf.mxu0 }
 0x249   : > { %v1048_v59 = vadd.f32 %v3079_v52, %v2893_v48  ;;  %v2572_v52 = vld [vmem:[%s4995_s5 + $0xe0] sm:$0xff] }
 0x24a   : > { %v3081_v38 = vpop.f32.mrf.mxu0 }
 0x24b   : > { %v3082_v49 = vadd.f32 %v3081_v38, %v3080_v37  ;;  %v4358_v1 = vmax.f32 %v1048_v59, 0.0  ;;  %v2570_v59 = vld [vmem:[%s4995_s5 + $0xd0] sm:$0xff] }
 0x24c   : > { %v3083_v39 = vpop.f32.mrf.mxu0 }
 0x24d   : > { %v1053_v56 = vadd.f32 %v3082_v49, %v2893_v48  ;;  %v2558_v49 = vld [vmem:[%s4995_s5 + $0x70] sm:$0xff] }
 0x24e   : > { %v3084_v40 = vpop.f32.mrf.mxu0 }
 0x24f   : > { %v3085_v46 = vadd.f32 %v3084_v40, %v3083_v39  ;;  %v4352_v63 = vmax.f32 %v1053_v56, 0.0 }
 0x250   : > { %v3086_v41 = vpop.f32.mrf.mxu0 }
 0x251   : > { %v1058_v53 = vadd.f32 %v3085_v46, %v2893_v48  ;;  %v2575_v46 = vld [vmem:[%s4995_s5 + $0xf8] sm:$0xff] }
 0x252   : > { %v3087_v42 = vpop.f32.mrf.mxu0 }
 0x253   : > { %v3088_v44 = vadd.f32 %v3087_v42, %v3086_v41  ;;  %v4346_v60 = vmax.f32 %v1058_v53, 0.0  ;;  %v2556_v53 = vld [vmem:[%s4995_s5 + $0x60] sm:$0xff] }
 0x254   : > { %v3089_v43 = vpop.f32.mrf.mxu0 }
 0x255   : > { %v1063_v50 = vadd.f32 %v3088_v44, %v2893_v48 }
 0x256   : > { %v3090_v45 = vpop.f32.mrf.mxu0 }
 0x257   : > { %v3091_v47 = vadd.f32 %v3090_v45, %v3089_v43  ;;  %v4340_v57 = vmax.f32 %v1063_v50, 0.0  ;;  %v2573_v50 = vld [vmem:[%s4995_s5 + $0xe8] sm:$0xff] }
 0x259   : > { %v1068_v51 = vadd.f32 %v3091_v47, %v2893_v48  ;;  %v2559_v47 = vld [vmem:[%s4995_s5 + $0x78] sm:$0xff]  ;;  %v2574_v48 = vld [vmem:[%s4995_s5 + $0xf0] sm:$0xff] }
 0x25b   : > { %v4338_v54 = vmax.f32 %v1068_v51, 0.0  ;;  %v2557_v51 = vld [vmem:[%s4995_s5 + $0x68] sm:$0xff] }
 0x25d   : > { %3464 = vmatprep.subr.mxu1 %v4338_v54  ;;  %3521 = vmatprep.subr.mxu0 %v4338_v54 }
 0x25e   : > { %3465 = vmatpush3.msra.mxu1 %v4338_v54  ;;  %3522 = vmatpush3.msra.mxu0 %v4338_v54 }
 0x25f   : > { %3466 = vmatprep.subr.mxu1 %v4340_v57  ;;  %3523 = vmatprep.subr.mxu0 %v4340_v57 }
 0x260   : > { %3467 = vmatpush3.msra.mxu1 %v4340_v57  ;;  %3524 = vmatpush3.msra.mxu0 %v4340_v57 }
 0x261   : > { %3468 = vmatprep.subr.mxu1 %v4346_v60  ;;  %3525 = vmatprep.subr.mxu0 %v4346_v60 }
 0x262   : > { %3469 = vmatpush3.msra.mxu1 %v4346_v60  ;;  %3526 = vmatpush3.msra.mxu0 %v4346_v60 }
 0x263   : > { %3470 = vmatprep.subr.mxu1 %v4352_v63  ;;  %3527 = vmatprep.subr.mxu0 %v4352_v63 }
 0x264   : > { %3471 = vmatpush3.msra.mxu1 %v4352_v63  ;;  %3528 = vmatpush3.msra.mxu0 %v4352_v63 }
 0x265   : > { %3472 = vmatprep.subr.mxu1 %v4358_v1  ;;  %3529 = vmatprep.subr.mxu0 %v4358_v1 }
 0x266   : > { %3473 = vmatpush3.msra.mxu1 %v4358_v1  ;;  %3530 = vmatpush3.msra.mxu0 %v4358_v1 }
 0x267   : > { %3474 = vmatprep.subr.mxu1 %v4364_v3  ;;  %3531 = vmatprep.subr.mxu0 %v4364_v3 }
 0x268   : > { %3475 = vmatpush3.msra.mxu1 %v4364_v3  ;;  %3532 = vmatpush3.msra.mxu0 %v4364_v3 }
 0x269   : > { %3476 = vmatprep.subr.mxu1 %v4370_v4  ;;  %3533 = vmatprep.subr.mxu0 %v4370_v4 }
 0x26a   : > { %3477 = vmatpush3.msra.mxu1 %v4370_v4  ;;  %3534 = vmatpush3.msra.mxu0 %v4370_v4 }
 0x26b   : > { %3478 = vmatprep.subr.mxu1 %v4376_v5  ;;  %3535 = vmatprep.subr.mxu0 %v4376_v5 }
 0x26c   : > { %3479 = vmatpush3.msra.mxu1 %v4376_v5  ;;  %3536 = vmatpush3.msra.mxu0 %v4376_v5 }
 0x26d   : > { %3481 = vmatmul.mubr.msk.f32.vlgmr.msra.gmra.mxu1 %vm910_vm2, %v1080_v6  ;;  %3483 = vmatprep.subr.mxu1 %v4338_v54  ;;  %v2565_v6 = vld [vmem:[%s4995_s5 + $0xa8] sm:$0xff] }
 0x26e   : > { %3559 = vmatprep.subr.mxu0 %v4338_v54  ;;  %3484 = vmatpush3.msra.mxu1 %v4338_v54 }
 0x26f   : > { %3538 = vmatmul.mubr.msk.f32.vlgmr.msra.gmra.mxu0 %vm910_vm2, %v2905_v7  ;;  %3485 = vmatprep.subr.mxu1 %v4340_v57  ;;  %v2549_v7 = vld [vmem:[%s4995_s5 + $0x28] sm:$0xff] }
 0x270   : > { %3560 = vmatpush3.msra.mxu0 %v4338_v54  ;;  %3486 = vmatpush3.msra.mxu1 %v4340_v57 }
 0x271   : > { %3561 = vmatprep.subr.mxu0 %v4340_v57  ;;  %3487 = vmatprep.subr.mxu1 %v4346_v60 }
 0x272   : > { %3562 = vmatpush3.msra.mxu0 %v4340_v57  ;;  %3488 = vmatpush3.msra.mxu1 %v4346_v60 }
 0x273   : > { %3563 = vmatprep.subr.mxu0 %v4346_v60  ;;  %3489 = vmatprep.subr.mxu1 %v4352_v63 }
 0x274   : > { %3564 = vmatpush3.msra.mxu0 %v4346_v60  ;;  %3490 = vmatpush3.msra.mxu1 %v4352_v63 }
 0x275   : > { %3565 = vmatprep.subr.mxu0 %v4352_v63  ;;  %3491 = vmatprep.subr.mxu1 %v4358_v1 }
 0x276   : > { %3566 = vmatpush3.msra.mxu0 %v4352_v63  ;;  %3492 = vmatpush3.msra.mxu1 %v4358_v1 }
 0x277   : > { %3567 = vmatprep.subr.mxu0 %v4358_v1  ;;  %3493 = vmatprep.subr.mxu1 %v4364_v3 }
 0x278   : > { %3568 = vmatpush3.msra.mxu0 %v4358_v1  ;;  %3494 = vmatpush3.msra.mxu1 %v4364_v3 }
 0x279   : > { %3569 = vmatprep.subr.mxu0 %v4364_v3  ;;  %3495 = vmatprep.subr.mxu1 %v4370_v4 }
 0x27a   : > { %3570 = vmatpush3.msra.mxu0 %v4364_v3  ;;  %3496 = vmatpush3.msra.mxu1 %v4370_v4 }
 0x27b   : > { %3571 = vmatprep.subr.mxu0 %v4370_v4  ;;  %3497 = vmatprep.subr.mxu1 %v4376_v5 }
 0x27c   : > { %3572 = vmatpush3.msra.mxu0 %v4370_v4  ;;  %3498 = vmatpush3.msra.mxu1 %v4376_v5 }
 0x27d   : > { %3573 = vmatprep.subr.mxu0 %v4376_v5  ;;  %3499 = vmatprep.mubr.msk.f32.mxu1 %vm910_vm2, %v2896_v8  ;;  %v2564_v8 = vld [vmem:[%s4995_s5 + $0xa0] sm:$0xff] }
 0x27e   : > { %3574 = vmatpush3.msra.mxu0 %v4376_v5  ;;  %3575 = vmatprep.mubr.msk.f32.mxu0 %vm910_vm2, %v2912_v9 }
 0x27f   : > { %3500 = vmatmul.mubr.msk.f32.vlgmr.msra.gmra.mxu1 %vm910_vm2, %v2897_v10  ;;  %3502 = vmatprep.subr.mxu1 %v4338_v54  ;;  %v2548_v10 = vld [vmem:[%s4995_s5 + $0x20] sm:$0xff] }
 0x280   : > { %3576 = vmatmul.mubr.msk.f32.vlgmr.msra.gmra.mxu0 %vm910_vm2, %v2913_v11  ;;  %3597 = vmatprep.subr.mxu0 %v4338_v54  ;;  %v2563_v11 = vld [vmem:[%s4995_s5 + $0x98] sm:$0xff] }
 0x281   : > { %3503 = vmatpush3.msra.mxu1 %v4338_v54  ;;  %3598 = vmatpush3.msra.mxu0 %v4338_v54 }
 0x282   : > { %3504 = vmatprep.subr.mxu1 %v4340_v57  ;;  %3599 = vmatprep.subr.mxu0 %v4340_v57 }
 0x283   : > { %3505 = vmatpush3.msra.mxu1 %v4340_v57  ;;  %3600 = vmatpush3.msra.mxu0 %v4340_v57 }
 0x284   : > { %3506 = vmatprep.subr.mxu1 %v4346_v60  ;;  %3601 = vmatprep.subr.mxu0 %v4346_v60 }
 0x285   : > { %3507 = vmatpush3.msra.mxu1 %v4346_v60  ;;  %3602 = vmatpush3.msra.mxu0 %v4346_v60 }
 0x286   : > { %3508 = vmatprep.subr.mxu1 %v4352_v63  ;;  %3603 = vmatprep.subr.mxu0 %v4352_v63 }
 0x287   : > { %3509 = vmatpush3.msra.mxu1 %v4352_v63  ;;  %3604 = vmatpush3.msra.mxu0 %v4352_v63 }
 0x288   : > { %3510 = vmatprep.subr.mxu1 %v4358_v1  ;;  %3605 = vmatprep.subr.mxu0 %v4358_v1 }
 0x289   : > { %3511 = vmatpush3.msra.mxu1 %v4358_v1  ;;  %3606 = vmatpush3.msra.mxu0 %v4358_v1 }
 0x28a   : > { %3512 = vmatprep.subr.mxu1 %v4364_v3  ;;  %3607 = vmatprep.subr.mxu0 %v4364_v3 }
 0x28b   : > { %3513 = vmatpush3.msra.mxu1 %v4364_v3  ;;  %3608 = vmatpush3.msra.mxu0 %v4364_v3 }
 0x28c   : > { %3514 = vmatprep.subr.mxu1 %v4370_v4  ;;  %3609 = vmatprep.subr.mxu0 %v4370_v4 }
 0x28d   : > { %3515 = vmatpush3.msra.mxu1 %v4370_v4  ;;  %3610 = vmatpush3.msra.mxu0 %v4370_v4 }
 0x28e   : > { %3516 = vmatprep.subr.mxu1 %v4376_v5  ;;  %3611 = vmatprep.subr.mxu0 %v4376_v5 }
 0x28f   : > { %3517 = vmatpush3.msra.mxu1 %v4376_v5  ;;  %3518 = vmatprep.mubr.msk.f32.mxu1 %vm910_vm2, %v2900_v12  ;;  %v2547_v12 = vld [vmem:[%s4995_s5 + $0x18] sm:$0xff] }
 0x290   : > { %3612 = vmatpush3.msra.mxu0 %v4376_v5  ;;  %3613 = vmatprep.mubr.msk.f32.mxu0 %vm910_vm2, %v2920_v13  ;;  %v2562_v13 = vld [vmem:[%s4995_s5 + $0x90] sm:$0xff] }
 0x291   : > { %3519 = vmatmul.mubr.msk.f32.vlgmr.msra.gmra.mxu1 %vm910_vm2, %v2901_v14  ;;  %3540 = vmatprep.subr.mxu1 %v4338_v54 }
 0x292   : > { %3614 = vmatmul.mubr.msk.f32.vlgmr.msra.gmra.mxu0 %vm910_vm2, %v2921_v15  ;;  %3635 = vmatprep.subr.mxu0 %v4338_v54 }
 0x293   : > { %3541 = vmatpush3.msra.mxu1 %v4338_v54  ;;  %3636 = vmatpush3.msra.mxu0 %v4338_v54 }
 0x294   : > { %3542 = vmatprep.subr.mxu1 %v4340_v57  ;;  %3637 = vmatprep.subr.mxu0 %v4340_v57 }
 0x295   : > { %3543 = vmatpush3.msra.mxu1 %v4340_v57  ;;  %3638 = vmatpush3.msra.mxu0 %v4340_v57 }
 0x296   : > { %3544 = vmatprep.subr.mxu1 %v4346_v60  ;;  %3639 = vmatprep.subr.mxu0 %v4346_v60 }
 0x297   : > { %3545 = vmatpush3.msra.mxu1 %v4346_v60  ;;  %3640 = vmatpush3.msra.mxu0 %v4346_v60 }
 0x298   : > { %3546 = vmatprep.subr.mxu1 %v4352_v63  ;;  %3641 = vmatprep.subr.mxu0 %v4352_v63 }
 0x299   : > { %3547 = vmatpush3.msra.mxu1 %v4352_v63  ;;  %3642 = vmatpush3.msra.mxu0 %v4352_v63 }
 0x29a   : > { %3548 = vmatprep.subr.mxu1 %v4358_v1  ;;  %3643 = vmatprep.subr.mxu0 %v4358_v1 }
 0x29b   : > { %3549 = vmatpush3.msra.mxu1 %v4358_v1  ;;  %3644 = vmatpush3.msra.mxu0 %v4358_v1 }
 0x29c   : > { %3550 = vmatprep.subr.mxu1 %v4364_v3  ;;  %3645 = vmatprep.subr.mxu0 %v4364_v3 }
 0x29d   : > { %3551 = vmatpush3.msra.mxu1 %v4364_v3  ;;  %3646 = vmatpush3.msra.mxu0 %v4364_v3 }
 0x29e   : > { %3552 = vmatprep.subr.mxu1 %v4370_v4  ;;  %3647 = vmatprep.subr.mxu0 %v4370_v4 }
 0x29f   : > { %3553 = vmatpush3.msra.mxu1 %v4370_v4  ;;  %3648 = vmatpush3.msra.mxu0 %v4370_v4 }
 0x2a0   : > { %3554 = vmatprep.subr.mxu1 %v4376_v5  ;;  %3649 = vmatprep.subr.mxu0 %v4376_v5 }
 0x2a1   : > { %3555 = vmatpush3.msra.mxu1 %v4376_v5  ;;  %3556 = vmatprep.mubr.msk.f32.mxu1 %vm910_vm2, %v2908_v16  ;;  %v2546_v16 = vld [vmem:[%s4995_s5 + $0x10] sm:$0xff] }
 0x2a2   : > { %3650 = vmatpush3.msra.mxu0 %v4376_v5  ;;  %3557 = vmatmul.mubr.msk.f32.vlgmr.msra.gmra.mxu1 %vm910_vm2, %v2909_v17  ;;  %v2561_v17 = vld [vmem:[%s4995_s5 + $0x88] sm:$0xff] }
 0x2a3   : > { %3578 = vmatprep.subr.mxu1 %v4338_v54  ;;  %3651 = vmatprep.mubr.msk.f32.mxu0 %vm910_vm2, %v2928_v18  ;;  %v2545_v18 = vld [vmem:[%s4995_s5 + $0x8] sm:$0xff] }
 0x2a4   : > { %3673 = vmatprep.subr.mxu0 %v4338_v54  ;;  %3579 = vmatpush3.msra.mxu1 %v4338_v54 }
 0x2a5   : > { %3652 = vmatmul.mubr.msk.f32.vlgmr.msra.gmra.mxu0 %vm910_vm2, %v2929_v19  ;;  %3580 = vmatprep.subr.mxu1 %v4340_v57  ;;  %v2560_v19 = vld [vmem:[%s4995_s5 + $0x80] sm:$0xff] }
 0x2a6   : > { %3674 = vmatpush3.msra.mxu0 %v4338_v54  ;;  %3581 = vmatpush3.msra.mxu1 %v4340_v57 }
 0x2a7   : > { %3675 = vmatprep.subr.mxu0 %v4340_v57  ;;  %3582 = vmatprep.subr.mxu1 %v4346_v60 }
 0x2a8   : > { %3676 = vmatpush3.msra.mxu0 %v4340_v57  ;;  %3583 = vmatpush3.msra.mxu1 %v4346_v60 }
 0x2a9   : > { %3677 = vmatprep.subr.mxu0 %v4346_v60  ;;  %3584 = vmatprep.subr.mxu1 %v4352_v63 }
 0x2aa   : > { %3678 = vmatpush3.msra.mxu0 %v4346_v60  ;;  %3585 = vmatpush3.msra.mxu1 %v4352_v63 }
 0x2ab   : > { %3679 = vmatprep.subr.mxu0 %v4352_v63  ;;  %3586 = vmatprep.subr.mxu1 %v4358_v1 }
 0x2ac   : > { %3680 = vmatpush3.msra.mxu0 %v4352_v63  ;;  %3587 = vmatpush3.msra.mxu1 %v4358_v1 }
 0x2ad   : > { %3681 = vmatprep.subr.mxu0 %v4358_v1  ;;  %3588 = vmatprep.subr.mxu1 %v4364_v3 }
 0x2ae   : > { %3682 = vmatpush3.msra.mxu0 %v4358_v1  ;;  %3589 = vmatpush3.msra.mxu1 %v4364_v3 }
 0x2af   : > { %3683 = vmatprep.subr.mxu0 %v4364_v3  ;;  %3590 = vmatprep.subr.mxu1 %v4370_v4 }
 0x2b0   : > { %3684 = vmatpush3.msra.mxu0 %v4364_v3  ;;  %3591 = vmatpush3.msra.mxu1 %v4370_v4 }
 0x2b1   : > { %3685 = vmatprep.subr.mxu0 %v4370_v4  ;;  %3592 = vmatprep.subr.mxu1 %v4376_v5 }
 0x2b2   : > { %3686 = vmatpush3.msra.mxu0 %v4370_v4  ;;  %3593 = vmatpush3.msra.mxu1 %v4376_v5 }
 0x2b3   : > { %3687 = vmatprep.subr.mxu0 %v4376_v5  ;;  %3594 = vmatprep.mubr.msk.f32.mxu1 %vm910_vm2, %v2916_v20  ;;  %v2544_v20 = vld [vmem:[%s4995_s5] sm:$0xff] }
 0x2b4   : > { %3688 = vmatpush3.msra.mxu0 %v4376_v5  ;;  %3595 = vmatmul.mubr.msk.f32.vlgmr.msra.gmra.mxu1 %vm910_vm2, %v2917_v21 }
 0x2b5   : > { %3616 = vmatprep.subr.mxu1 %v4338_v54  ;;  %3689 = vmatprep.mubr.msk.f32.mxu0 %vm910_vm2, %v2936_v22 }
 0x2b6   : > { %3711 = vmatprep.subr.mxu0 %v4338_v54  ;;  %3617 = vmatpush3.msra.mxu1 %v4338_v54 }
 0x2b7   : > { %3690 = vmatmul.mubr.msk.f32.vlgmr.msra.gmra.mxu0 %vm910_vm2, %v2937_v23  ;;  %3618 = vmatprep.subr.mxu1 %v4340_v57 }
 0x2b8   : > { %3712 = vmatpush3.msra.mxu0 %v4338_v54  ;;  %3619 = vmatpush3.msra.mxu1 %v4340_v57 }
 0x2b9   : > { %3713 = vmatprep.subr.mxu0 %v4340_v57  ;;  %3620 = vmatprep.subr.mxu1 %v4346_v60 }
 0x2ba   : > { %3714 = vmatpush3.msra.mxu0 %v4340_v57  ;;  %3621 = vmatpush3.msra.mxu1 %v4346_v60 }
 0x2bb   : > { %3715 = vmatprep.subr.mxu0 %v4346_v60  ;;  %3622 = vmatprep.subr.mxu1 %v4352_v63 }
 0x2bc   : > { %3716 = vmatpush3.msra.mxu0 %v4346_v60  ;;  %3623 = vmatpush3.msra.mxu1 %v4352_v63 }
 0x2bd   : > { %3717 = vmatprep.subr.mxu0 %v4352_v63  ;;  %3624 = vmatprep.subr.mxu1 %v4358_v1 }
 0x2be   : > { %3718 = vmatpush3.msra.mxu0 %v4352_v63  ;;  %3625 = vmatpush3.msra.mxu1 %v4358_v1 }
 0x2bf   : > { %3719 = vmatprep.subr.mxu0 %v4358_v1  ;;  %3626 = vmatprep.subr.mxu1 %v4364_v3 }
 0x2c0   : > { %3720 = vmatpush3.msra.mxu0 %v4358_v1  ;;  %3627 = vmatpush3.msra.mxu1 %v4364_v3 }
 0x2c1   : > { %3721 = vmatprep.subr.mxu0 %v4364_v3  ;;  %3628 = vmatprep.subr.mxu1 %v4370_v4 }
 0x2c2   : > { %3722 = vmatpush3.msra.mxu0 %v4364_v3  ;;  %3629 = vmatpush3.msra.mxu1 %v4370_v4 }
 0x2c3   : > { %3723 = vmatprep.subr.mxu0 %v4370_v4  ;;  %3630 = vmatprep.subr.mxu1 %v4376_v5 }
 0x2c4   : > { %3724 = vmatpush3.msra.mxu0 %v4370_v4  ;;  %3631 = vmatpush3.msra.mxu1 %v4376_v5 }
 0x2c5   : > { %3725 = vmatprep.subr.mxu0 %v4376_v5  ;;  %3632 = vmatprep.mubr.msk.f32.mxu1 %vm910_vm2, %v2924_v24 }
 0x2c6   : > { %3726 = vmatpush3.msra.mxu0 %v4376_v5  ;;  %3727 = vmatprep.mubr.msk.f32.mxu0 %vm910_vm2, %v2944_v25 }
 0x2c7   : > { %3633 = vmatmul.mubr.msk.f32.vlgmr.msra.gmra.mxu1 %vm910_vm2, %v2925_v26  ;;  %3654 = vmatprep.subr.mxu1 %v4338_v54 }
 0x2c8   : > { %3728 = vmatmul.mubr.msk.f32.vlgmr.msra.gmra.mxu0 %vm910_vm2, %v2945_v27  ;;  %3749 = vmatprep.subr.mxu0 %v4338_v54 }
 0x2c9   : > { %3655 = vmatpush3.msra.mxu1 %v4338_v54  ;;  %3750 = vmatpush3.msra.mxu0 %v4338_v54 }
 0x2ca   : > { %3656 = vmatprep.subr.mxu1 %v4340_v57  ;;  %3751 = vmatprep.subr.mxu0 %v4340_v57 }
 0x2cb   : > { %3657 = vmatpush3.msra.mxu1 %v4340_v57  ;;  %3752 = vmatpush3.msra.mxu0 %v4340_v57 }
 0x2cc   : > { %3658 = vmatprep.subr.mxu1 %v4346_v60  ;;  %3753 = vmatprep.subr.mxu0 %v4346_v60 }
 0x2cd   : > { %3659 = vmatpush3.msra.mxu1 %v4346_v60  ;;  %3754 = vmatpush3.msra.mxu0 %v4346_v60 }
 0x2ce   : > { %3660 = vmatprep.subr.mxu1 %v4352_v63  ;;  %3755 = vmatprep.subr.mxu0 %v4352_v63 }
 0x2cf   : > { %3661 = vmatpush3.msra.mxu1 %v4352_v63  ;;  %3756 = vmatpush3.msra.mxu0 %v4352_v63 }
 0x2d0   : > { %3662 = vmatprep.subr.mxu1 %v4358_v1  ;;  %3757 = vmatprep.subr.mxu0 %v4358_v1 }
 0x2d1   : > { %3663 = vmatpush3.msra.mxu1 %v4358_v1  ;;  %3758 = vmatpush3.msra.mxu0 %v4358_v1 }
 0x2d2   : > { %3664 = vmatprep.subr.mxu1 %v4364_v3  ;;  %3759 = vmatprep.subr.mxu0 %v4364_v3 }
 0x2d3   : > { %3665 = vmatpush3.msra.mxu1 %v4364_v3  ;;  %3760 = vmatpush3.msra.mxu0 %v4364_v3 }
 0x2d4   : > { %3666 = vmatprep.subr.mxu1 %v4370_v4  ;;  %3761 = vmatprep.subr.mxu0 %v4370_v4 }
 0x2d5   : > { %3667 = vmatpush3.msra.mxu1 %v4370_v4  ;;  %3762 = vmatpush3.msra.mxu0 %v4370_v4 }
 0x2d6   : > { %3668 = vmatprep.subr.mxu1 %v4376_v5  ;;  %3763 = vmatprep.subr.mxu0 %v4376_v5 }
 0x2d7   : > { %3669 = vmatpush3.msra.mxu1 %v4376_v5  ;;  %3670 = vmatprep.mubr.msk.f32.mxu1 %vm910_vm2, %v2932_v28 }
 0x2d8   : > { %3764 = vmatpush3.msra.mxu0 %v4376_v5  ;;  %3765 = vmatprep.mubr.msk.f32.mxu0 %vm910_vm2, %v2952_v29 }
 0x2d9   : > { %3671 = vmatmul.mubr.msk.f32.vlgmr.msra.gmra.mxu1 %vm910_vm2, %v2933_v30  ;;  %3692 = vmatprep.subr.mxu1 %v4338_v54 }
 0x2da   : > { %3766 = vmatmul.mubr.msk.f32.vlgmr.msra.gmra.mxu0 %vm910_vm2, %v2953_v31  ;;  %3693 = vmatpush3.msra.mxu1 %v4338_v54 }
 0x2db   : > { %3694 = vmatprep.subr.mxu1 %v4340_v57  ;;  %3708 = vmatprep.mubr.msk.f32.mxu1 %vm910_vm2, %v2940_v32 }
 0x2dc   : > { %3695 = vmatpush3.msra.mxu1 %v4340_v57 }
 0x2dd   : > { %3696 = vmatprep.subr.mxu1 %v4346_v60 }
 0x2de   : > { %3697 = vmatpush3.msra.mxu1 %v4346_v60 }
 0x2df   : > { %3698 = vmatprep.subr.mxu1 %v4352_v63 }
 0x2e0   : > { %3699 = vmatpush3.msra.mxu1 %v4352_v63 }
 0x2e1   : > { %3700 = vmatprep.subr.mxu1 %v4358_v1 }
 0x2e2   : > { %3701 = vmatpush3.msra.mxu1 %v4358_v1 }
 0x2e3   : > { %3702 = vmatprep.subr.mxu1 %v4364_v3 }
 0x2e4   : > { %3703 = vmatpush3.msra.mxu1 %v4364_v3 }
 0x2e5   : > { %3704 = vmatprep.subr.mxu1 %v4370_v4 }
 0x2e6   : > { %3705 = vmatpush3.msra.mxu1 %v4370_v4 }
 0x2e7   : > { %3706 = vmatprep.subr.mxu1 %v4376_v5 }
 0x2e8   : > { %3707 = vmatpush3.msra.mxu1 %v4376_v5 }
 0x2e9   : > { %3709 = vmatmul.mubr.msk.f32.vlgmr.msra.gmra.mxu1 %vm910_vm2, %v2941_v33  ;;  %3730 = vmatprep.subr.mxu1 %v4338_v54 }
 0x2ea   : > { %3731 = vmatpush3.msra.mxu1 %v4338_v54  ;;  %3746 = vmatprep.mubr.msk.f32.mxu1 %vm910_vm2, %v2948_v34  ;;  %v2607_v34 = vld [vmem:[%s4995_s5 + $0x1f8] sm:$0xff] }
 0x2eb   : > { %3732 = vmatprep.subr.mxu1 %v4340_v57  ;;  %3290 = vmatprep.subr.mxu0 %v2607_v34 }
 0x2ec   : > { %3733 = vmatpush3.msra.mxu1 %v4340_v57  ;;  %v2555_v57 = vld [vmem:[%s4995_s5 + $0x58] sm:$0xff] }
 0x2ed   : > { %3734 = vmatprep.subr.mxu1 %v4346_v60 }
 0x2ee   : > { %3735 = vmatpush3.msra.mxu1 %v4346_v60  ;;  %v2554_v60 = vld [vmem:[%s4995_s5 + $0x50] sm:$0xff] }
 0x2ef   : > { %3736 = vmatprep.subr.mxu1 %v4352_v63 }
 0x2f0   : > { %3737 = vmatpush3.msra.mxu1 %v4352_v63  ;;  %v2553_v63 = vld [vmem:[%s4995_s5 + $0x48] sm:$0xff] }
 0x2f1   : > { %3738 = vmatprep.subr.mxu1 %v4358_v1 }
 0x2f2   : > { %3739 = vmatpush3.msra.mxu1 %v4358_v1  ;;  %v2552_v1 = vld [vmem:[%s4995_s5 + $0x40] sm:$0xff] }
 0x2f3   : > { %3740 = vmatprep.subr.mxu1 %v4364_v3 }
 0x2f4   : > { %3741 = vmatpush3.msra.mxu1 %v4364_v3  ;;  %v2551_v3 = vld [vmem:[%s4995_s5 + $0x38] sm:$0xff] }
 0x2f5   : > { %3742 = vmatprep.subr.mxu1 %v4370_v4 }
 0x2f6   : > { %3743 = vmatpush3.msra.mxu1 %v4370_v4  ;;  %v2566_v4 = vld [vmem:[%s4995_s5 + $0xb0] sm:$0xff] }
 0x2f7   : > { %3744 = vmatprep.subr.mxu1 %v4376_v5 }
 0x2f8   : > { %3745 = vmatpush3.msra.mxu1 %v4376_v5  ;;  %v2550_v5 = vld [vmem:[%s4995_s5 + $0x30] sm:$0xff] }
 0x2f9   : > { %3747 = vmatmul.mubr.msk.f32.vlgmr.msra.gmra.mxu1 %vm910_vm2, %v2949_v35  ;;  %3252 = vmatprep.subr.mxu1 %v2575_v46  ;;  %v2591_v35 = vld [vmem:[%s4995_s5 + $0x178] sm:$0xff] }
 0x2fa   : > { %3253 = vmatpush3.msra.mxu1 %v2559_v47  ;;  %3291 = vmatpush3.msra.mxu0 %v2591_v35  ;;  %v2602_v47 = vld [vmem:[%s4995_s5 + $0x1d0] sm:$0xff] }
 0x2fb   : > { %3254 = vmatprep.subr.mxu1 %v2574_v48 }
 0x2fc   : > { %3255 = vmatpush3.msra.mxu1 %v2558_v49  ;;  %v2586_v49 = vld [vmem:[%s4995_s5 + $0x150] sm:$0xff] }
 0x2fd   : > { %3256 = vmatprep.subr.mxu1 %v2573_v50 }
 0x2fe   : > { %3257 = vmatpush3.msra.mxu1 %v2557_v51  ;;  %v2601_v51 = vld [vmem:[%s4995_s5 + $0x1c8] sm:$0xff] }
 0x2ff   : > { %3258 = vmatprep.subr.mxu1 %v2572_v52 }
 0x300   : > { %3259 = vmatpush3.msra.mxu1 %v2556_v53  ;;  %v2585_v53 = vld [vmem:[%s4995_s5 + $0x148] sm:$0xff] }
 0x301   : > { %3260 = vmatprep.subr.mxu1 %v2571_v55  ;;  %v2584_v55 = vld [vmem:[%s4995_s5 + $0x140] sm:$0xff] }
 0x302   : > { %3261 = vmatpush3.msra.mxu1 %v2555_v57  ;;  %v2583_v57 = vld [vmem:[%s4995_s5 + $0x138] sm:$0xff] }
 0x303   : > { %3262 = vmatprep.subr.mxu1 %v2570_v59  ;;  %v2582_v59 = vld [vmem:[%s4995_s5 + $0x130] sm:$0xff] }
 0x304   : > { %3263 = vmatpush3.msra.mxu1 %v2554_v60  ;;  %v2597_v60 = vld [vmem:[%s4995_s5 + $0x1a8] sm:$0xff] }
 0x305   : > { %3264 = vmatprep.subr.mxu1 %v2569_v61  ;;  %v2581_v61 = vld [vmem:[%s4995_s5 + $0x128] sm:$0xff] }
 0x306   : > { %3265 = vmatpush3.msra.mxu1 %v2553_v63 }
 0x307   : > { %3266 = vmatprep.subr.mxu1 %v2568_v0  ;;  %v2580_v0 = vld [vmem:[%s4995_s5 + $0x120] sm:$0xff] }
 0x308   : > { %3267 = vmatpush3.msra.mxu1 %v2552_v1  ;;  %v2595_v1 = vld [vmem:[%s4995_s5 + $0x198] sm:$0xff] }
 0x309   : > { %3268 = vmatprep.subr.mxu1 %v2567_v2  ;;  %v2579_v2 = vld [vmem:[%s4995_s5 + $0x118] sm:$0xff] }
 0x30a   : > { %3269 = vmatpush3.msra.mxu1 %v2551_v3  ;;  %v2594_v3 = vld [vmem:[%s4995_s5 + $0x190] sm:$0xff] }
 0x30b   : > { %3270 = vmatprep.subr.mxu1 %v2566_v4 }
 0x30c   : > { %3271 = vmatpush3.msra.mxu1 %v2550_v5 }
 0x30d   : > { %3272 = vmatprep.subr.mxu1 %v2565_v6 }
 0x30e   : > { %3273 = vmatpush3.msra.mxu1 %v2549_v7  ;;  %v2578_v7 = vld [vmem:[%s4995_s5 + $0x110] sm:$0xff] }
 0x30f   : > { %3274 = vmatprep.subr.mxu1 %v2564_v8  ;;  %v2593_v8 = vld [vmem:[%s4995_s5 + $0x188] sm:$0xff] }
 0x310   : > { %3275 = vmatpush3.msra.mxu1 %v2548_v10  ;;  %v2592_v10 = vld [vmem:[%s4995_s5 + $0x180] sm:$0xff] }
 0x311   : > { %3276 = vmatprep.subr.mxu1 %v2563_v11 }
 0x312   : > { %3277 = vmatpush3.msra.mxu1 %v2547_v12  ;;  %v2576_v12 = vld [vmem:[%s4995_s5 + $0x100] sm:$0xff] }
 0x313   : > { %3278 = vmatprep.subr.mxu1 %v2562_v13 }
 0x314   : > { %3279 = vmatpush3.msra.mxu1 %v2546_v16 }
 0x315   : > { %3280 = vmatprep.subr.mxu1 %v2561_v17 }
 0x316   : > { %3281 = vmatpush3.msra.mxu1 %v2545_v18 }
 0x317   : > { %3282 = vmatprep.subr.mxu1 %v2560_v19 }
 0x318   : > { %3283 = vmatpush3.msra.mxu1 %v2544_v20 }
 0x32d   : > { %v4730_v37 = vpop.f32.mrf.mxu1 }
 0x32f   : > { %v3539_v36 = vpop.f32.mrf.mxu0  ;;  %v4732_v39 = vpop.f32.mrf.mxu1 }
 0x331   : > { %v1405_v38 = vpop.f32.mrf.mxu0 }
 0x33f   : > { %v3501_v40 = vpop.f32.mrf.mxu1 }
 0x340   : > { %v3577_v41 = vpop.f32.mrf.mxu0 }
 0x341   : > { %v3820_v42 = vpack.i.bf16 %v3501_v40, %v3577_v41  ;;  %v1237_v43 = vpop.f32.mrf.mxu1  ;;  %v2605_v40 = vld [vmem:[%s4995_s5 + $0x1e8] sm:$0xff] }
 0x342   : > { %v1573_v44 = vpop.f32.mrf.mxu0  ;;  %v2589_v41 = vld [vmem:[%s4995_s5 + $0x168] sm:$0xff] }
 0x343   : > { %v3825_v45 = vpack.i.bf16 %v1237_v43, %v1573_v44  ;;  %3821 = vrot.lane.b32.xlu1 %v3820_v42, %s3889_s16  ;;  %v2604_v42 = vld [vmem:[%s4995_s5 + $0x1e0] sm:$0xff]  ;;  %v2603_v44 = vld [vmem:[%s4995_s5 + $0x1d8] sm:$0xff] }
 0x344   : > { %v2588_v43 = vld [vmem:[%s4995_s5 + $0x160] sm:$0xff] }
 0x345   : > { %3826 = vrot.lane.b32.xlu0 %v3825_v45, %s3889_s16  ;;  %v2587_v45 = vld [vmem:[%s4995_s5 + $0x158] sm:$0xff] }
 0x351   : > { %v3520_v9 = vpop.f32.mrf.mxu1 }
 0x352   : > { %v3615_v54 = vpop.f32.mrf.mxu0 }
 0x353   : > { %v3830_v56 = vpack.i.bf16 %v3539_v36, %v3615_v54  ;;  %v1321_v14 = vpop.f32.mrf.mxu1  ;;  %v2606_v36 = vld [vmem:[%s4995_s5 + $0x1f0] sm:$0xff]  ;;  %v2600_v54 = vld [vmem:[%s4995_s5 + $0x1c0] sm:$0xff] }
 0x354   : > { %v1741_v58 = vpop.f32.mrf.mxu0  ;;  %3292 = vmatprep.subr.mxu0 %v2606_v36 }
 0x355   : > { %3831 = vrot.lane.b32.xlu0 %v3830_v56, %s3890_s20  ;;  %v3835_v62 = vpack.i.bf16 %v1405_v38, %v1741_v58  ;;  %v2590_v38 = vld [vmem:[%s4995_s5 + $0x170] sm:$0xff]  ;;  %v2599_v56 = vld [vmem:[%s4995_s5 + $0x1b8] sm:$0xff] }
 0x356   : > { %3293 = vmatpush3.msra.mxu0 %v2590_v38  ;;  %v2598_v58 = vld [vmem:[%s4995_s5 + $0x1b0] sm:$0xff] }
 0x357   : > { %3294 = vmatprep.subr.mxu0 %v2605_v40 }
 0x358   : > { %3295 = vmatpush3.msra.mxu0 %v2589_v41 }
 0x359   : > { %3836 = vrot.lane.b32.xlu0 %v3835_v62, %s3890_s20  ;;  %3296 = vmatprep.subr.mxu0 %v2604_v42  ;;  %v2596_v62 = vld [vmem:[%s4995_s5 + $0x1a0] sm:$0xff] }
 0x35a   : > { %3297 = vmatpush3.msra.mxu0 %v2588_v43 }
 0x35b   : > { %3298 = vmatprep.subr.mxu0 %v2603_v44 }
 0x35c   : > { %3299 = vmatpush3.msra.mxu0 %v2587_v45 }
 0x35d   : > { %3300 = vmatprep.subr.mxu0 %v2602_v47 }
 0x35e   : > { %3301 = vmatpush3.msra.mxu0 %v2586_v49 }
 0x35f   : > { %3302 = vmatprep.subr.mxu0 %v2601_v51 }
 0x360   : > { %3303 = vmatpush3.msra.mxu0 %v2585_v53 }
 0x361   : > { %3304 = vmatprep.subr.mxu0 %v2600_v54 }
 0x362   : > { %v4819_v15 = vpop.f32.mrf.mxu1  ;;  %3305 = vmatpush3.msra.mxu0 %v2584_v55 }
 0x363   : > { %3306 = vmatprep.subr.mxu0 %v2599_v56 }
 0x364   : > { %v4836_v21 = vpop.f32.mrf.mxu1  ;;  %3307 = vmatpush3.msra.mxu0 %v2583_v57 }
 0x365   : > { %v3653_v25 = vpop.f32.mrf.mxu0  ;;  %3308 = vmatprep.subr.mxu0 %v2598_v58 }
 0x366   : > { %3309 = vmatpush3.msra.mxu0 %v2582_v59 }
 0x367   : > { %v1909_v27 = vpop.f32.mrf.mxu0  ;;  %3310 = vmatprep.subr.mxu0 %v2597_v60 }
 0x368   : > { %3311 = vmatpush3.msra.mxu0 %v2581_v61 }
 0x369   : > { %3312 = vmatprep.subr.mxu0 %v2596_v62 }
 0x36a   : > { %3313 = vmatpush3.msra.mxu0 %v2580_v0 }
 0x36b   : > { %3314 = vmatprep.subr.mxu0 %v2595_v1 }
 0x36c   : > { %3315 = vmatpush3.msra.mxu0 %v2579_v2 }
 0x36d   : > { %3316 = vmatprep.subr.mxu0 %v2594_v3 }
 0x36e   : > { %3317 = vmatpush3.msra.mxu0 %v2578_v7 }
 0x36f   : > { %3318 = vmatprep.subr.mxu0 %v2593_v8 }
 0x374   : > { %v3596_v22 = vpop.f32.mrf.mxu1 }
 0x375   : > { %v3840_v23 = vpack.i.bf16 %v3520_v9, %v3596_v22  ;;  %v2577_v9 = vld [vmem:[%s4995_s5 + $0x108] sm:$0xff] }
 0x376   : > { %v1657_v24 = vpop.f32.mrf.mxu1  ;;  %3319 = vmatpush3.msra.mxu0 %v2577_v9 }
 0x377   : > { %3841 = vrot.lane.b32.xlu1 %v3840_v23, %s3888_s9  ;;  %v3845_v26 = vpack.i.bf16 %v1321_v14, %v1657_v24  ;;  %v3691_v28 = vpop.f32.mrf.mxu0  ;;  %3320 = vmatprep.subr.mxu0 %v2592_v10 }
 0x378   : > { %3321 = vmatpush3.msra.mxu0 %v2576_v12 }
 0x379   : > { %v2077_v29 = vpop.f32.mrf.mxu0 }
 0x37b   : > { %3846 = vrot.lane.b32.xlu1 %v3845_v26, %s3888_s9 }
 0x387   : > { %v4913_v63 = vpop.f32.mrf.mxu1 }
 0x388   : > { %v3729_v30 = vpop.f32.mrf.mxu0 }
 0x389   : > { %v3855_v33 = vpack.i.bf16 %v3653_v25, %v3729_v30  ;;  %v4927_v4 = vpop.f32.mrf.mxu1 }
 0x38a   : > { %v2245_v31 = vpop.f32.mrf.mxu0 }
 0x38b   : > { %v3850_v32 = vpack.i.bf16 %v1909_v27, %v2245_v31 }
 0x38d   : > { %3851 = vrot.lane.b32.xlu1 %v3850_v32, %s3889_s16 }
 0x391   : > { %3856 = vrot.lane.b32.xlu1 %v3855_v33, %s3889_s16  ;;  %s278_s16 = scalar_lea.vmem %s4997_s7, %s2959_s13 }
 0x399   : > { %v3672_v5 = vpop.f32.mrf.mxu1 }
 0x39a   : > { %v3767_v46 = vpop.f32.mrf.mxu0 }
 0x39b   : > { %v3875_v48 = vpack.i.bf16 %v3691_v28, %v3767_v46  ;;  %v1993_v6 = vpop.f32.mrf.mxu1 }
 0x39c   : > { %v2413_v50 = vpop.f32.mrf.mxu0 }
 0x39d   : > { %v3860_v52 = vpack.i.bf16 %v2077_v29, %v2413_v50  ;;  %3876 = vrot.lane.b32.xlu1 %v3875_v48, %s3890_s20 }
 0x39f   : > { %3861 = vrot.lane.b32.xlu0 %v3860_v52, %s3890_s20 }
 0x3a9   : > { %v4941_v11 = vpop.f32.mrf.mxu1 }
 0x3ab   : > { %v2161_v13 = vpop.f32.mrf.mxu1 }
 0x3b5   : > { %v3822_v20 = vpop.permute.xlu1 %3821 }
 0x3b6   : > { %v3823_v24 = vunpack.i.l.bf16 %v3822_v20  ;;  %v3824_v29 = vunpack.i.h.bf16 %v3822_v20 }
 0x3b7   : > { %v3827_v19 = vpop.permute.xlu0 %3826 }
 0x3b8   : > { %v3829_v25 = vunpack.i.h.bf16 %v3827_v19  ;;  %v3828_v26 = vunpack.i.l.bf16 %v3827_v19  ;;  %v2527_v34 = vsel %vm2518_vm3, %v4819_v15, %v3823_v24  ;;  %v2520_v15 = vsel %vm2518_vm3, %v4730_v37, %v3824_v29 }
 0x3b9   : > { %v3748_v14 = vpop.f32.mrf.mxu1 }
 0x3ba   : > { %v3870_v18 = vpack.i.bf16 %v3672_v5, %v3748_v14  ;;  %v2519_v31 = vsel %vm2518_vm3, %v4732_v39, %v3829_v25  ;;  %v2526_v40 = vsel %vm2518_vm3, %v4836_v21, %v3828_v26 }
 0x3bb   : > { %v2329_v16 = vpop.f32.mrf.mxu1 }
 0x3bc   : > { %v3865_v17 = vpack.i.bf16 %v1993_v6, %v2329_v16 }
 0x3be   : > { %3866 = vrot.lane.b32.xlu0 %v3865_v17, %s3888_s9 }
 0x3c2   : > { %3871 = vrot.lane.b32.xlu0 %v3870_v18, %s3888_s9 }
 0x3c7   : > { %v3832_v22 = vpop.permute.xlu0 %3831 }
 0x3c8   : > { %v3833_v44 = vunpack.i.l.bf16 %v3832_v22  ;;  %v3834_v47 = vunpack.i.h.bf16 %v3832_v22 }
 0x3cb   : > { %v3837_v27 = vpop.permute.xlu0 %3836 }
 0x3cc   : > { %v3839_v35 = vunpack.i.h.bf16 %v3837_v27  ;;  %v3838_v36 = vunpack.i.l.bf16 %v3837_v27 }
 0x3e9   : > { %v3842_v23 = vpop.permute.xlu1 %3841 }
 0x3ea   : > { %v3843_v28 = vunpack.i.l.bf16 %v3842_v23  ;;  %v3844_v38 = vunpack.i.h.bf16 %v3842_v23 }
 0x3ec   : > { %v2529_v43 = vsel %vm910_vm2, %v2527_v34, %v3843_v28  ;;  %v2522_v21 = vsel %vm910_vm2, %v2520_v15, %v3844_v38 }
 0x3ed   : > { %v3847_v30 = vpop.permute.xlu1 %3846  ;;  %v2531_v46 = vsel %vm2523_vm4, %v2529_v43, %v3833_v44  ;;  %v2525_v48 = vsel %vm2523_vm4, %v2522_v21, %v3834_v47 }
 0x3ee   : > { %v3849_v32 = vunpack.i.h.bf16 %v3847_v30  ;;  %v3848_v33 = vunpack.i.l.bf16 %v3847_v30 }
 0x3f0   : > { %v2528_v41 = vsel %vm910_vm2, %v2526_v40, %v3848_v33  ;;  %v2521_v42 = vsel %vm910_vm2, %v2519_v31, %v3849_v32 }
 0x3f1   : > { %v2530_v39 = vsel %vm2523_vm4, %v2528_v41, %v3838_v36  ;;  %v2524_v45 = vsel %vm2523_vm4, %v2521_v42, %v3839_v35 }
 0x3f2   : > { %2679 = vmatprep.mubr.f32.mxu1 %v2530_v39 }
 0x3f3   : > { %2680 = vmatmul.mubr.f32.vlgmr.msra.gmra.mxu1 %v2524_v45 }
 0x3f4   : > { %2684 = vmatprep.mubr.f32.mxu1 %v2531_v46 }
 0x3f7   : > { %2685 = vmatmul.mubr.f32.gmra.mxu1 %v2525_v48 }
 0x3ff   : > { %v3852_v49 = vpop.permute.xlu1 %3851 }
 0x400   : > { %v3854_v51 = vunpack.i.h.bf16 %v3852_v49  ;;  %v3853_v52 = vunpack.i.l.bf16 %v3852_v49 }
 0x402   : > { %v2532_v55 = vsel %vm2518_vm3, %v4927_v4, %v3854_v51  ;;  %v2538_v57 = vsel %vm2518_vm3, %v2161_v13, %v3853_v52 }
 0x403   : > { %v3857_v53 = vpop.permute.xlu1 %3856 }
 0x404   : > { %v3859_v58 = vunpack.i.h.bf16 %v3857_v53  ;;  %v3858_v59 = vunpack.i.l.bf16 %v3857_v53 }
 0x406   : > { %v2539_v9 = vsel %vm2518_vm3, %v4941_v11, %v3858_v59  ;;  %v2533_v10 = vsel %vm2518_vm3, %v4913_v63, %v3859_v58  ;;  %v2956_v11 = vld [vmem:[%s4996_s6] ss:$0 sm:$0xff] }
 0x40f   : > { %v3877_v62 = vpop.permute.xlu1 %3876 }
 0x410   : > { %v3879_v7 = vunpack.i.h.bf16 %v3877_v62  ;;  %v3878_v8 = vunpack.i.l.bf16 %v3877_v62 }
 0x411   : > { %v3862_v50 = vpop.permute.xlu0 %3861 }
 0x412   : > { %v3864_v60 = vunpack.i.h.bf16 %v3862_v50  ;;  %v3863_v61 = vunpack.i.l.bf16 %v3862_v50 }
 0x430   : > { %v3867_v54 = vpop.permute.xlu0 %3866 }
 0x431   : > { %v3869_v37 = vunpack.i.h.bf16 %v3867_v54  ;;  %v3868_v56 = vunpack.i.l.bf16 %v3867_v54 }
 0x433   : > { %v2540_v0 = vsel %vm910_vm2, %v2538_v57, %v3868_v56  ;;  %v2534_v1 = vsel %vm910_vm2, %v2532_v55, %v3869_v37 }
 0x434   : > { %v3872_v2 = vpop.permute.xlu0 %3871  ;;  %v2542_v3 = vsel %vm2523_vm4, %v2540_v0, %v3863_v61  ;;  %v2536_v5 = vsel %vm2523_vm4, %v2534_v1, %v3864_v60 }
 0x435   : > { %v3874_v6 = vunpack.i.h.bf16 %v3872_v2  ;;  %v3873_v4 = vunpack.i.l.bf16 %v3872_v2  ;;  %2754 = vmatprep.mubr.f32.mxu0 %v2542_v3 }
 0x436   : > { %2755 = vmatmul.mubr.f32.vlgmr.msra.gmra.mxu0 %v2536_v5 }
 0x437   : > { %v2541_v12 = vsel %vm910_vm2, %v2539_v9, %v3873_v4  ;;  %v2535_v13 = vsel %vm910_vm2, %v2533_v10, %v3874_v6 }
 0x438   : > { %v2543_v14 = vsel %vm2523_vm4, %v2541_v12, %v3878_v8  ;;  %v2537_v16 = vsel %vm2523_vm4, %v2535_v13, %v3879_v7 }
 0x439   : > { %2759 = vmatprep.mubr.f32.mxu0 %v2543_v14 }
 0x43a   : > { %2760 = vmatmul.mubr.f32.gmra.mxu0 %v2537_v16 }
 0x4b3   : > { %v3284_v17 = vpop.f32.mrf.mxu1 }
 0x4b5   : > { %v3285_v18 = vpop.f32.mrf.mxu1 }
 0x4b6   : > { %v3286_v20 = vadd.f32 %v3285_v18, %v3284_v17 }
 0x4b7   : > { %v3287_v19 = vpop.f32.mrf.mxu1 }
 0x4b8   : > { %v2682_v24 = vadd.f32 %v3286_v20, %v2956_v11 }
 0x4b9   : > { %v3288_v63 = vpop.f32.mrf.mxu1 }
 0x4ba   : > { %v3289_v25 = vadd.f32 %v3288_v63, %v3287_v19 }
 0x4bc   : > { %v2687_v30 = vadd.f32 %v3289_v25, %v2956_v11 }
 0x4f6   : > { %v3322_v22 = vpop.f32.mrf.mxu0 }
 0x4f8   : > { %v3323_v23 = vpop.f32.mrf.mxu0 }
 0x4f9   : > { %v3324_v26 = vadd.f32 %v3323_v23, %v3322_v22 }
 0x4fa   : > { %v3325_v27 = vpop.f32.mrf.mxu0 }
 0x4fb   : > { %v2757_v28 = vadd.f32 %v3324_v26, %v2682_v24 }
 0x4fc   : > { %v3326_v29 = vpop.f32.mrf.mxu0 }
 0x4fd   : > { %v2765_v31 = vmax.f32 %v2757_v28, 0.0  ;;  %v3327_v32 = vadd.f32 %v3326_v29, %v3325_v27 }
 0x4ff   : > { %2767 = vst.msk [vmem:[%s278_s16] sm:$0xff] %vm910_vm2, %v2765_v31  ;;  %v2762_v33 = vadd.f32 %v3327_v32, %v2687_v30 }
 0x501   : > { %v2766_v34 = vmax.f32 %v2762_v33, 0.0 }
 0x503   : > { %2769 = vst.msk [vmem:[%s278_s16 + $0x8] sm:$0x1] %vm2768_vm5, %v2766_v34 }
 0x504 PF: > { %s17_s24 = sadd.s32 1, %s3886_s24  }
 0x505   : > { %p14_p4 = scmp.ge.s32.totalorder %s17_s24, 4  }
 0x507   :  { %16 = sbr.rel (!%p14_p4) target bundleno = 1 (0x1), region = 96 }

</bundles_post_ra>
